<compile_context>
chip_gen: v6e
topology: v6e:2x2x1
jax: 0.10.0
libtpu: 0.0.40
codegen_flags: <defaults>
</compile_context>

<pallas_src>
import functools

import jax
import jax.numpy as jnp
from jax import lax
from jax.experimental import pallas as pl
from jax.experimental.pallas import tpu as pltpu

# ----------------------------------------------------------------------------
# Hyperparameters (mirrors hp used in MSA_EF.__init__, small synthetic sizes)
# ----------------------------------------------------------------------------
VOCAB = 50
D_TIN = 32                      # text dim; hp.d_tout = hp.d_tin
D_VIN, D_VH, D_VOUT = 16, 16, 16
D_AIN, D_AH, D_AOUT = 20, 16, 16
D_PRJH, N_CLASS = 32, 1
B = 8                           # full f32 sublane tile (perf review)
T_TXT, T_VIS, T_AUD = 6, 8, 8
DIM_SUM = D_TIN + D_AOUT + D_VOUT


# ----------------------------------------------------------------------------
# Parameter init (deterministic, synthetic)
# ----------------------------------------------------------------------------
def init_params(key):
    ks = jax.random.split(key, 20)

    def nrm(k, shape, scale=0.1):
        return jax.random.normal(k, shape, dtype=jnp.float32) * scale

    p = {}
    p["emb"] = nrm(ks[0], (VOCAB, D_TIN), 0.5)
    # visual RNNEncoder (LSTM weights packed PyTorch-style: (4H, in))
    p["v_W_ih"] = nrm(ks[1], (4 * D_VH, D_VIN))
    p["v_W_hh"] = nrm(ks[2], (4 * D_VH, D_VH))
    p["v_b"] = nrm(ks[3], (4 * D_VH,))            # b_ih + b_hh combined
    p["v_W_out"] = nrm(ks[4], (D_VOUT, D_VH))
    p["v_b_out"] = nrm(ks[5], (D_VOUT,))
    # acoustic RNNEncoder
    p["a_W_ih"] = nrm(ks[6], (4 * D_AH, D_AIN))
    p["a_W_hh"] = nrm(ks[7], (4 * D_AH, D_AH))
    p["a_b"] = nrm(ks[8], (4 * D_AH,))
    p["a_W_out"] = nrm(ks[9], (D_AOUT, D_AH))
    p["a_b_out"] = nrm(ks[10], (D_AOUT,))
    # SubNet fusion_prj
    p["f_W1"] = nrm(ks[11], (D_PRJH, DIM_SUM))
    p["f_b1"] = nrm(ks[12], (D_PRJH,))
    p["f_W2"] = nrm(ks[13], (D_PRJH, D_PRJH))
    p["f_b2"] = nrm(ks[14], (D_PRJH,))
    p["f_W3"] = nrm(ks[15], (N_CLASS, D_PRJH))
    p["f_b3"] = nrm(ks[16], (N_CLASS,))
    return p


# ----------------------------------------------------------------------------
# One-time parameter prep (OFF the per-call hot path — perf review item 2)
# ----------------------------------------------------------------------------
def prepare_params(params):
    """Fold all weight algebra into kernel-ready tensors, computed once."""
    Ha, Hv = D_AH, D_VH
    H2 = Ha + Hv

    def gate_cols(W, col_off):
        # W: (4h, F) PyTorch-packed (i,f,g,o) -> (F, 4*H2); gate k occupies
        # columns [k*H2+col_off, k*H2+col_off+h), zeros elsewhere.
        h = W.shape[0] // 4
        F = W.shape[1]
        out = jnp.zeros((F, 4 * H2), jnp.float32)
        for k in range(4):
            out = out.at[:, k * H2 + col_off:k * H2 + col_off + h].set(
                W[k * h:(k + 1) * h].T)
        return out

    # Split input-gate weights (acoustic cols at offset 0, visual at offset Ha)
    wxa = gate_cols(params["a_W_ih"], 0)                      # (d_ain, 128)
    wxv = gate_cols(params["v_W_ih"], Ha)                     # (d_vin, 128)
    # Block-diagonal hidden-gate weights: one (B,128) matmul drives both LSTMs.
    wh = jnp.concatenate([gate_cols(params["a_W_hh"], 0),
                          gate_cols(params["v_W_hh"], Ha)], axis=0)   # (H2, 128)
    a_b, v_b = params["a_b"], params["v_b"]
    bg = jnp.concatenate(
        [jnp.concatenate([a_b[k * Ha:(k + 1) * Ha], v_b[k * Hv:(k + 1) * Hv]])
         for k in range(4)]).reshape(1, 4 * H2)

    # Fold RNNEncoder.linear_1 + SubNet.linear_1 (concat-split):
    #   tanh(cat[text, h_a@Wao^T+bao, h_v@Wvo^T+bvo] @ W1^T + b1)
    # = tanh(emb[tok]@W1t^T + h@[(W1a@Wao)^T ; (W1v@Wvo)^T] + (b1 + W1a@bao + W1v@bvo))
    W1, b1 = params["f_W1"], params["f_b1"]
    W1t = W1[:, :D_TIN]
    W1a = W1[:, D_TIN:D_TIN + D_AOUT]
    W1v = W1[:, D_TIN + D_AOUT:]
    emb_wt = params["emb"] @ W1t.T                            # (VOCAB, d_prjh): row gather == text proj
    whv = jnp.concatenate([(W1a @ params["a_W_out"]).T,
                           (W1v @ params["v_W_out"]).T], axis=0)        # (H2, d_prjh)
    b1f = (b1 + W1a @ params["a_b_out"] + W1v @ params["v_b_out"]).reshape(1, -1)

    return dict(wxa=wxa, wxv=wxv, wh=wh, bg=bg,
                emb_wt=emb_wt, whv=whv, b1f=b1f,
                w2=params["f_W2"].T, b2=params["f_b2"].reshape(1, -1),
                w3=params["f_W3"].T, b3=params["f_b3"].reshape(1, -1))


# ----------------------------------------------------------------------------
# Fused Pallas kernel: hoisted input proj + merged LSTM recurrence + gather + MLP
# ----------------------------------------------------------------------------
def _msa_ef_kernel(ha, tok_ref, ac_ref, vi_ref, alen_ref, vlen_ref,
                   wxa_ref, wxv_ref, wh_ref, bg_ref,
                   embp_ref, whv_ref, b1_ref, w2_ref, b2_ref, w3_ref, b3_ref,
                   out_ref, xg_ref):
    TB, G = xg_ref.shape
    Bb = tok_ref.shape[0]
    T = TB // Bb
    H2 = G // 4
    hv = H2 - ha

    dot = lambda a, b: jnp.dot(a, b, preferred_element_type=jnp.float32)

    # ---- Prologue (off the serial chain): input proj + bias for ALL T steps at once.
    #      (T*B, F) @ (F, 4*H2) — one MXU pass per modality, bias folded in here.
    xg_ref[...] = (dot(ac_ref[...], wxa_ref[...]) +
                   dot(vi_ref[...], wxv_ref[...]) + bg_ref[...])

    # Per-modality valid-length columns ([:ha] masks with a_len, [ha:] with v_len),
    # emulating pack_padded_sequence's final hidden state. Built once, loop-invariant.
    lens = jnp.concatenate(
        [jnp.broadcast_to(alen_ref[...], (Bb, ha)),
         jnp.broadcast_to(vlen_ref[...], (Bb, hv))], axis=1)            # (Bb, H2) int32

    wh = wh_ref[...]                                                    # loop invariant

    def step(t, carry):
        h, c = carry
        start = pl.multiple_of(t * Bb, Bb)            # Bb=8 -> sublane-aligned slices
        gates = xg_ref[pl.ds(start, Bb), :] + dot(h, wh)                # (Bb, 4*H2)
        sig = jax.nn.sigmoid(gates)                   # one full-vreg EUP push (i,f,o)
        tnh = jnp.tanh(gates)                         # one full-vreg EUP push (g)
        i = sig[:, 0:H2]
        f = sig[:, H2:2 * H2]
        g = tnh[:, 2 * H2:3 * H2]
        o = sig[:, 3 * H2:4 * H2]
        c_new = f * c + i * g
        h_new = o * jnp.tanh(c_new)
        valid = lens > t
        return jnp.where(valid, h_new, h), jnp.where(valid, c_new, c)

    zeros = jnp.zeros((Bb, H2), jnp.float32)
    h_fin, _ = lax.fori_loop(0, T, step, (zeros, zeros), unroll=True)

    # ---- Epilogue: fused text-embedding gather (table pre-projected through W1_text)
    #      + SubNet fusion MLP.
    text_proj = jnp.concatenate(
        [embp_ref[pl.ds(tok_ref[b], 1), :] for b in range(Bb)], axis=0)  # (Bb, d_prjh)
    y1 = jnp.tanh(text_proj + dot(h_fin, whv_ref[...]) + b1_ref[...])
    fusion = jnp.tanh(dot(y1, w2_ref[...]) + b2_ref[...])
    out_ref[...] = dot(fusion, w3_ref[...]) + b3_ref[...]


# ----------------------------------------------------------------------------
# MSA_EF.forward (hot path: only activation reshapes + one pallas_call)
# ----------------------------------------------------------------------------
def msa_ef_forward(prepped, sentences, visual, acoustic, v_len, a_len,
                   bert_sent, bert_sent_type, bert_sent_mask):
    # text_enc (LanguageEmbeddingLayer, hp.use_bert=False): enc_word[:, 0, :];
    # the embedding gather is fused into the kernel via the pre-projected table.
    # TODO(synk): hp.use_bert=True (pretrained BERT) text branch not reproduced here.
    del bert_sent, bert_sent_type, bert_sent_mask

    Ta, Bb, _ = acoustic.shape
    Tv = visual.shape[0]
    T = max(Ta, Tv)
    H2 = D_AH + D_VH

    ac = acoustic.astype(jnp.float32)
    vi = visual.astype(jnp.float32)
    if Ta < T:
        ac = jnp.pad(ac, ((0, T - Ta), (0, 0), (0, 0)))
    if Tv < T:
        vi = jnp.pad(vi, ((0, T - Tv), (0, 0), (0, 0)))
    # Time-major flatten: row t*Bb + b == x[t, b]; contiguous, no cross-sublane work.
    ac2d = ac.reshape(T * Bb, D_AIN)
    vi2d = vi.reshape(T * Bb, D_VIN)

    tok = sentences[:, 0].astype(jnp.int32)                     # (B,) token ids -> SMEM
    alen2 = a_len.astype(jnp.int32).reshape(Bb, 1)
    vlen2 = v_len.astype(jnp.int32).reshape(Bb, 1)

    vmem = functools.partial(pl.BlockSpec, memory_space=pltpu.MemorySpace.VMEM)
    smem = functools.partial(pl.BlockSpec, memory_space=pltpu.MemorySpace.SMEM)

    # Single fused kernel; whole-array VMEM blocks, no grid (footprint is tiny on all
    # of v5e/v6e/v7x — incl. v7x's 64 MiB VMEM; a grid would only add overhead).
    return pl.pallas_call(
        functools.partial(_msa_ef_kernel, D_AH),
        out_shape=jax.ShapeDtypeStruct((Bb, N_CLASS), jnp.float32),
        in_specs=[smem()] + [vmem()] * 15,
        out_specs=vmem(),
        scratch_shapes=[pltpu.VMEM((T * Bb, 4 * H2), jnp.float32)],
    )(tok, ac2d, vi2d, alen2, vlen2,
      prepped["wxa"], prepped["wxv"], prepped["wh"], prepped["bg"],
      prepped["emb_wt"], prepped["whv"], prepped["b1f"],
      prepped["w2"], prepped["b2"], prepped["w3"], prepped["b3"])


# ----------------------------------------------------------------------------
# Pure-JAX reference (for correctness check)
# ----------------------------------------------------------------------------
def _ref_lstm(x, lengths, W_ih, W_hh, b, W_out, b_out):
    T, Bb, _ = x.shape
    H = W_hh.shape[1]
    h = jnp.zeros((Bb, H), jnp.float32)
    c = jnp.zeros((Bb, H), jnp.float32)
    for t in range(T):
        gates = x[t] @ W_ih.T + h @ W_hh.T + b
        i = jax.nn.sigmoid(gates[:, :H])
        f = jax.nn.sigmoid(gates[:, H:2 * H])
        g = jnp.tanh(gates[:, 2 * H:3 * H])
        o = jax.nn.sigmoid(gates[:, 3 * H:])
        c_new = f * c + i * g
        h_new = o * jnp.tanh(c_new)
        m = (lengths > t)[:, None]
        h = jnp.where(m, h_new, h)
        c = jnp.where(m, c_new, c)
    return h @ W_out.T + b_out


def msa_ef_reference(params, sentences, visual, acoustic, v_len, a_len):
    text = params["emb"][sentences[:, 0]]
    ah = _ref_lstm(acoustic, a_len, params["a_W_ih"], params["a_W_hh"],
                   params["a_b"], params["a_W_out"], params["a_b_out"])
    vh = _ref_lstm(visual, v_len, params["v_W_ih"], params["v_W_hh"],
                   params["v_b"], params["v_W_out"], params["v_b_out"])
    x = jnp.concatenate([text, ah, vh], axis=1)
    y1 = jnp.tanh(x @ params["f_W1"].T + params["f_b1"])
    fusion = jnp.tanh(y1 @ params["f_W2"].T + params["f_b2"])
    return fusion @ params["f_W3"].T + params["f_b3"]


# ----------------------------------------------------------------------------
if __name__ == "__main__":
    key = jax.random.PRNGKey(0)
    pkey, dkey = jax.random.split(key)
    params = init_params(pkey)
    prepped = prepare_params(params)        # one-time weight algebra, off the hot path

    k1, k2, k3, k4, k5 = jax.random.split(dkey, 5)
    sentences = jax.random.randint(k1, (B, T_TXT), 0, VOCAB, dtype=jnp.int32)
    visual = jax.random.normal(k2, (T_VIS, B, D_VIN), dtype=jnp.float32)
    acoustic = jax.random.normal(k3, (T_AUD, B, D_AIN), dtype=jnp.float32)
    v_len = jax.random.randint(k4, (B,), 2, T_VIS + 1, dtype=jnp.int32)
    a_len = jax.random.randint(k5, (B,), 2, T_AUD + 1, dtype=jnp.int32)
    bert_sent = jnp.zeros((B, T_TXT + 2), jnp.int32)       # unused (use_bert=False)
    bert_sent_type = jnp.zeros_like(bert_sent)
    bert_sent_mask = jnp.ones_like(bert_sent)

    fwd = jax.jit(msa_ef_forward)
    preds = fwd(prepped, sentences, visual, acoustic, v_len, a_len,
                bert_sent, bert_sent_type, bert_sent_mask)
    preds = jax.block_until_ready(preds)

    ref = msa_ef_reference(params, sentences, visual, acoustic, v_len, a_len)
    assert preds.shape == (B, N_CLASS), preds.shape
    assert jnp.allclose(preds, ref, rtol=5e-2, atol=5e-2), (preds, ref)
    print("KERNEL_OK")
</pallas_src>

<mosaic_0001>
module attributes {stable_mosaic.version = 11 : i64} {
  func.func @_msa_ef_kernel(%arg0: memref<8xi32, #tpu.memory_space<smem>>, %arg1: memref<64x20xf32, #tpu.memory_space<vmem>>, %arg2: memref<64x16xf32, #tpu.memory_space<vmem>>, %arg3: memref<8x1xi32, #tpu.memory_space<vmem>>, %arg4: memref<8x1xi32, #tpu.memory_space<vmem>>, %arg5: memref<20x128xf32, #tpu.memory_space<vmem>>, %arg6: memref<16x128xf32, #tpu.memory_space<vmem>>, %arg7: memref<32x128xf32, #tpu.memory_space<vmem>>, %arg8: memref<1x128xf32, #tpu.memory_space<vmem>>, %arg9: memref<50x32xf32, #tpu.memory_space<vmem>>, %arg10: memref<32x32xf32, #tpu.memory_space<vmem>>, %arg11: memref<1x32xf32, #tpu.memory_space<vmem>>, %arg12: memref<32x32xf32, #tpu.memory_space<vmem>>, %arg13: memref<1x32xf32, #tpu.memory_space<vmem>>, %arg14: memref<32x1xf32, #tpu.memory_space<vmem>>, %arg15: memref<1x1xf32, #tpu.memory_space<vmem>>, %arg16: memref<8x1xf32, #tpu.memory_space<vmem>>, %arg17: memref<64x128xf32, #tpu.memory_space<vmem>>) attributes {dimension_semantics = [], scalar_prefetch = 0 : i64, scratch_operands = 1 : i64, tpu.core_type = #tpu.core_type<tc>} {
    %c0 = arith.constant 0 : index
    %c0_0 = arith.constant 0 : index
    %0 = vector.load %arg1[%c0, %c0_0] : memref<64x20xf32, #tpu.memory_space<vmem>>, vector<64x20xf32>
    %c0_1 = arith.constant 0 : index
    %c0_2 = arith.constant 0 : index
    %1 = vector.load %arg5[%c0_1, %c0_2] : memref<20x128xf32, #tpu.memory_space<vmem>>, vector<20x128xf32>
    %cst = arith.constant dense<0.000000e+00> : vector<64x128xf32>
    %2 = tpu.matmul %0, %1, %cst {dimension_numbers = #tpu.dot_dimension_numbers<[1], [0], [0], [1], [0, 0, 1, 1], [], []>} : vector<64x20xf32>, vector<20x128xf32>, vector<64x128xf32> -> vector<64x128xf32>
    %c0_3 = arith.constant 0 : index
    %c0_4 = arith.constant 0 : index
    %3 = vector.load %arg2[%c0_3, %c0_4] : memref<64x16xf32, #tpu.memory_space<vmem>>, vector<64x16xf32>
    %c0_5 = arith.constant 0 : index
    %c0_6 = arith.constant 0 : index
    %4 = vector.load %arg6[%c0_5, %c0_6] : memref<16x128xf32, #tpu.memory_space<vmem>>, vector<16x128xf32>
    %cst_7 = arith.constant dense<0.000000e+00> : vector<64x128xf32>
    %5 = tpu.matmul %3, %4, %cst_7 {dimension_numbers = #tpu.dot_dimension_numbers<[1], [0], [0], [1], [0, 0, 1, 1], [], []>} : vector<64x16xf32>, vector<16x128xf32>, vector<64x128xf32> -> vector<64x128xf32>
    %6 = arith.addf %2, %5 : vector<64x128xf32>
    %c0_8 = arith.constant 0 : index
    %c0_9 = arith.constant 0 : index
    %7 = vector.load %arg8[%c0_8, %c0_9] : memref<1x128xf32, #tpu.memory_space<vmem>>, vector<1x128xf32>
    %8 = vector.broadcast %7 : vector<1x128xf32> to vector<64x128xf32>
    %9 = arith.addf %6, %8 : vector<64x128xf32>
    %c0_10 = arith.constant 0 : index
    %c0_11 = arith.constant 0 : index
    %10 = vector.load %arg17[%c0_10, %c0_11] : memref<64x128xf32, #tpu.memory_space<vmem>>, vector<64x128xf32>
    tpu.vector_store %arg17[%c0_10, %c0_11], %9 {strides = array<i32>} : memref<64x128xf32, #tpu.memory_space<vmem>>, vector<64x128xf32>,
    %c0_12 = arith.constant 0 : index
    %c0_13 = arith.constant 0 : index
    %11 = vector.load %arg3[%c0_12, %c0_13] : memref<8x1xi32, #tpu.memory_space<vmem>>, vector<8x1xi32>
    %12 = vector.shape_cast %11 : vector<8x1xi32> to vector<8x1xi32>
    %13 = vector.broadcast %12 : vector<8x1xi32> to vector<8x16xi32>
    %c0_14 = arith.constant 0 : index
    %c0_15 = arith.constant 0 : index
    %14 = vector.load %arg4[%c0_14, %c0_15] : memref<8x1xi32, #tpu.memory_space<vmem>>, vector<8x1xi32>
    %15 = vector.shape_cast %14 : vector<8x1xi32> to vector<8x1xi32>
    %16 = vector.broadcast %15 : vector<8x1xi32> to vector<8x16xi32>
    %17 = tpu.concatenate %13, %16 in 1 : vector<8x16xi32>, vector<8x16xi32> -> vector<8x32xi32>
    %c0_16 = arith.constant 0 : index
    %c0_17 = arith.constant 0 : index
    %18 = vector.load %arg7[%c0_16, %c0_17] : memref<32x128xf32, #tpu.memory_space<vmem>>, vector<32x128xf32>
    %cst_18 = arith.constant 0.000000e+00 : f32
    %19 = vector.broadcast %cst_18 : f32 to vector<8x32xf32>
    %c0_i32 = arith.constant 0 : i32
    %c8_i32 = arith.constant 8 : i32
    %20 = arith.muli %c0_i32, %c8_i32 : i32
    %21 = tpu.assume_multiple %20, 8 : i32
    %22 = arith.index_cast %21 : i32 to index
    %c0_19 = arith.constant 0 : index
    %23 = vector.load %arg17[%22, %c0_19] : memref<64x128xf32, #tpu.memory_space<vmem>>, vector<8x128xf32>
    %cst_20 = arith.constant dense<0.000000e+00> : vector<8x128xf32>
    %24 = tpu.matmul %19, %18, %cst_20 {dimension_numbers = #tpu.dot_dimension_numbers<[1], [0], [0], [1], [0, 0, 1, 1], [], []>} : vector<8x32xf32>, vector<32x128xf32>, vector<8x128xf32> -> vector<8x128xf32>
    %25 = arith.addf %23, %24 : vector<8x128xf32>
    %26 = arith.negf %25 : vector<8x128xf32>
    %27 = math.exp %26 : vector<8x128xf32>
    %cst_21 = arith.constant 1.000000e+00 : f32
    %28 = vector.broadcast %cst_21 : f32 to vector<8x128xf32>
    %29 = arith.addf %28, %27 : vector<8x128xf32>
    %30 = arith.divf %28, %29 : vector<8x128xf32>
    %31 = math.tanh %25 : vector<8x128xf32>
    %32 = vector.extract_strided_slice %30 {offsets = [0, 0], sizes = [8, 32], strides = [1, 1]} : vector<8x128xf32> to vector<8x32xf32>
    %33 = vector.extract_strided_slice %30 {offsets = [0, 32], sizes = [8, 32], strides = [1, 1]} : vector<8x128xf32> to vector<8x32xf32>
    %34 = vector.extract_strided_slice %31 {offsets = [0, 64], sizes = [8, 32], strides = [1, 1]} : vector<8x128xf32> to vector<8x32xf32>
    %35 = vector.extract_strided_slice %30 {offsets = [0, 96], sizes = [8, 32], strides = [1, 1]} : vector<8x128xf32> to vector<8x32xf32>
    %36 = arith.mulf %33, %19 : vector<8x32xf32>
    %37 = arith.mulf %32, %34 : vector<8x32xf32>
    %38 = arith.addf %36, %37 : vector<8x32xf32>
    %39 = math.tanh %38 : vector<8x32xf32>
    %40 = arith.mulf %35, %39 : vector<8x32xf32>
    %41 = vector.broadcast %c0_i32 : i32 to vector<8x32xi32>
    %42 = arith.cmpi sgt, %17, %41 : vector<8x32xi32>
    %43 = arith.select %42, %40, %19 : vector<8x32xi1>, vector<8x32xf32>
    %44 = arith.select %42, %38, %19 : vector<8x32xi1>, vector<8x32xf32>
    %c1_i32 = arith.constant 1 : i32
    %c8_i32_22 = arith.constant 8 : i32
    %45 = arith.muli %c1_i32, %c8_i32_22 : i32
    %46 = tpu.assume_multiple %45, 8 : i32
    %47 = arith.index_cast %46 : i32 to index
    %c0_23 = arith.constant 0 : index
    %48 = vector.load %arg17[%47, %c0_23] : memref<64x128xf32, #tpu.memory_space<vmem>>, vector<8x128xf32>
    %cst_24 = arith.constant dense<0.000000e+00> : vector<8x128xf32>
    %49 = tpu.matmul %43, %18, %cst_24 {dimension_numbers = #tpu.dot_dimension_numbers<[1], [0], [0], [1], [0, 0, 1, 1], [], []>} : vector<8x32xf32>, vector<32x128xf32>, vector<8x128xf32> -> vector<8x128xf32>
    %50 = arith.addf %48, %49 : vector<8x128xf32>
    %51 = arith.negf %50 : vector<8x128xf32>
    %52 = math.exp %51 : vector<8x128xf32>
    %cst_25 = arith.constant 1.000000e+00 : f32
    %53 = vector.broadcast %cst_25 : f32 to vector<8x128xf32>
    %54 = arith.addf %53, %52 : vector<8x128xf32>
    %55 = arith.divf %53, %54 : vector<8x128xf32>
    %56 = math.tanh %50 : vector<8x128xf32>
    %57 = vector.extract_strided_slice %55 {offsets = [0, 0], sizes = [8, 32], strides = [1, 1]} : vector<8x128xf32> to vector<8x32xf32>
    %58 = vector.extract_strided_slice %55 {offsets = [0, 32], sizes = [8, 32], strides = [1, 1]} : vector<8x128xf32> to vector<8x32xf32>
    %59 = vector.extract_strided_slice %56 {offsets = [0, 64], sizes = [8, 32], strides = [1, 1]} : vector<8x128xf32> to vector<8x32xf32>
    %60 = vector.extract_strided_slice %55 {offsets = [0, 96], sizes = [8, 32], strides = [1, 1]} : vector<8x128xf32> to vector<8x32xf32>
    %61 = arith.mulf %58, %44 : vector<8x32xf32>
    %62 = arith.mulf %57, %59 : vector<8x32xf32>
    %63 = arith.addf %61, %62 : vector<8x32xf32>
    %64 = math.tanh %63 : vector<8x32xf32>
    %65 = arith.mulf %60, %64 : vector<8x32xf32>
    %66 = vector.broadcast %c1_i32 : i32 to vector<8x32xi32>
    %67 = arith.cmpi sgt, %17, %66 : vector<8x32xi32>
    %68 = arith.select %67, %65, %43 : vector<8x32xi1>, vector<8x32xf32>
    %69 = arith.select %67, %63, %44 : vector<8x32xi1>, vector<8x32xf32>
    %c2_i32 = arith.constant 2 : i32
    %c8_i32_26 = arith.constant 8 : i32
    %70 = arith.muli %c2_i32, %c8_i32_26 : i32
    %71 = tpu.assume_multiple %70, 8 : i32
    %72 = arith.index_cast %71 : i32 to index
    %c0_27 = arith.constant 0 : index
    %73 = vector.load %arg17[%72, %c0_27] : memref<64x128xf32, #tpu.memory_space<vmem>>, vector<8x128xf32>
    %cst_28 = arith.constant dense<0.000000e+00> : vector<8x128xf32>
    %74 = tpu.matmul %68, %18, %cst_28 {dimension_numbers = #tpu.dot_dimension_numbers<[1], [0], [0], [1], [0, 0, 1, 1], [], []>} : vector<8x32xf32>, vector<32x128xf32>, vector<8x128xf32> -> vector<8x128xf32>
    %75 = arith.addf %73, %74 : vector<8x128xf32>
    %76 = arith.negf %75 : vector<8x128xf32>
    %77 = math.exp %76 : vector<8x128xf32>
    %cst_29 = arith.constant 1.000000e+00 : f32
    %78 = vector.broadcast %cst_29 : f32 to vector<8x128xf32>
    %79 = arith.addf %78, %77 : vector<8x128xf32>
    %80 = arith.divf %78, %79 : vector<8x128xf32>
    %81 = math.tanh %75 : vector<8x128xf32>
    %82 = vector.extract_strided_slice %80 {offsets = [0, 0], sizes = [8, 32], strides = [1, 1]} : vector<8x128xf32> to vector<8x32xf32>
    %83 = vector.extract_strided_slice %80 {offsets = [0, 32], sizes = [8, 32], strides = [1, 1]} : vector<8x128xf32> to vector<8x32xf32>
    %84 = vector.extract_strided_slice %81 {offsets = [0, 64], sizes = [8, 32], strides = [1, 1]} : vector<8x128xf32> to vector<8x32xf32>
    %85 = vector.extract_strided_slice %80 {offsets = [0, 96], sizes = [8, 32], strides = [1, 1]} : vector<8x128xf32> to vector<8x32xf32>
    %86 = arith.mulf %83, %69 : vector<8x32xf32>
    %87 = arith.mulf %82, %84 : vector<8x32xf32>
    %88 = arith.addf %86, %87 : vector<8x32xf32>
    %89 = math.tanh %88 : vector<8x32xf32>
    %90 = arith.mulf %85, %89 : vector<8x32xf32>
    %91 = vector.broadcast %c2_i32 : i32 to vector<8x32xi32>
    %92 = arith.cmpi sgt, %17, %91 : vector<8x32xi32>
    %93 = arith.select %92, %90, %68 : vector<8x32xi1>, vector<8x32xf32>
    %94 = arith.select %92, %88, %69 : vector<8x32xi1>, vector<8x32xf32>
    %c3_i32 = arith.constant 3 : i32
    %c8_i32_30 = arith.constant 8 : i32
    %95 = arith.muli %c3_i32, %c8_i32_30 : i32
    %96 = tpu.assume_multiple %95, 8 : i32
    %97 = arith.index_cast %96 : i32 to index
    %c0_31 = arith.constant 0 : index
    %98 = vector.load %arg17[%97, %c0_31] : memref<64x128xf32, #tpu.memory_space<vmem>>, vector<8x128xf32>
    %cst_32 = arith.constant dense<0.000000e+00> : vector<8x128xf32>
    %99 = tpu.matmul %93, %18, %cst_32 {dimension_numbers = #tpu.dot_dimension_numbers<[1], [0], [0], [1], [0, 0, 1, 1], [], []>} : vector<8x32xf32>, vector<32x128xf32>, vector<8x128xf32> -> vector<8x128xf32>
    %100 = arith.addf %98, %99 : vector<8x128xf32>
    %101 = arith.negf %100 : vector<8x128xf32>
    %102 = math.exp %101 : vector<8x128xf32>
    %cst_33 = arith.constant 1.000000e+00 : f32
    %103 = vector.broadcast %cst_33 : f32 to vector<8x128xf32>
    %104 = arith.addf %103, %102 : vector<8x128xf32>
    %105 = arith.divf %103, %104 : vector<8x128xf32>
    %106 = math.tanh %100 : vector<8x128xf32>
    %107 = vector.extract_strided_slice %105 {offsets = [0, 0], sizes = [8, 32], strides = [1, 1]} : vector<8x128xf32> to vector<8x32xf32>
    %108 = vector.extract_strided_slice %105 {offsets = [0, 32], sizes = [8, 32], strides = [1, 1]} : vector<8x128xf32> to vector<8x32xf32>
    %109 = vector.extract_strided_slice %106 {offsets = [0, 64], sizes = [8, 32], strides = [1, 1]} : vector<8x128xf32> to vector<8x32xf32>
    %110 = vector.extract_strided_slice %105 {offsets = [0, 96], sizes = [8, 32], strides = [1, 1]} : vector<8x128xf32> to vector<8x32xf32>
    %111 = arith.mulf %108, %94 : vector<8x32xf32>
    %112 = arith.mulf %107, %109 : vector<8x32xf32>
    %113 = arith.addf %111, %112 : vector<8x32xf32>
    %114 = math.tanh %113 : vector<8x32xf32>
    %115 = arith.mulf %110, %114 : vector<8x32xf32>
    %116 = vector.broadcast %c3_i32 : i32 to vector<8x32xi32>
    %117 = arith.cmpi sgt, %17, %116 : vector<8x32xi32>
    %118 = arith.select %117, %115, %93 : vector<8x32xi1>, vector<8x32xf32>
    %119 = arith.select %117, %113, %94 : vector<8x32xi1>, vector<8x32xf32>
    %c4_i32 = arith.constant 4 : i32
    %c8_i32_34 = arith.constant 8 : i32
    %120 = arith.muli %c4_i32, %c8_i32_34 : i32
    %121 = tpu.assume_multiple %120, 8 : i32
    %122 = arith.index_cast %121 : i32 to index
    %c0_35 = arith.constant 0 : index
    %123 = vector.load %arg17[%122, %c0_35] : memref<64x128xf32, #tpu.memory_space<vmem>>, vector<8x128xf32>
    %cst_36 = arith.constant dense<0.000000e+00> : vector<8x128xf32>
    %124 = tpu.matmul %118, %18, %cst_36 {dimension_numbers = #tpu.dot_dimension_numbers<[1], [0], [0], [1], [0, 0, 1, 1], [], []>} : vector<8x32xf32>, vector<32x128xf32>, vector<8x128xf32> -> vector<8x128xf32>
    %125 = arith.addf %123, %124 : vector<8x128xf32>
    %126 = arith.negf %125 : vector<8x128xf32>
    %127 = math.exp %126 : vector<8x128xf32>
    %cst_37 = arith.constant 1.000000e+00 : f32
    %128 = vector.broadcast %cst_37 : f32 to vector<8x128xf32>
    %129 = arith.addf %128, %127 : vector<8x128xf32>
    %130 = arith.divf %128, %129 : vector<8x128xf32>
    %131 = math.tanh %125 : vector<8x128xf32>
    %132 = vector.extract_strided_slice %130 {offsets = [0, 0], sizes = [8, 32], strides = [1, 1]} : vector<8x128xf32> to vector<8x32xf32>
    %133 = vector.extract_strided_slice %130 {offsets = [0, 32], sizes = [8, 32], strides = [1, 1]} : vector<8x128xf32> to vector<8x32xf32>
    %134 = vector.extract_strided_slice %131 {offsets = [0, 64], sizes = [8, 32], strides = [1, 1]} : vector<8x128xf32> to vector<8x32xf32>
    %135 = vector.extract_strided_slice %130 {offsets = [0, 96], sizes = [8, 32], strides = [1, 1]} : vector<8x128xf32> to vector<8x32xf32>
    %136 = arith.mulf %133, %119 : vector<8x32xf32>
    %137 = arith.mulf %132, %134 : vector<8x32xf32>
    %138 = arith.addf %136, %137 : vector<8x32xf32>
    %139 = math.tanh %138 : vector<8x32xf32>
    %140 = arith.mulf %135, %139 : vector<8x32xf32>
    %141 = vector.broadcast %c4_i32 : i32 to vector<8x32xi32>
    %142 = arith.cmpi sgt, %17, %141 : vector<8x32xi32>
    %143 = arith.select %142, %140, %118 : vector<8x32xi1>, vector<8x32xf32>
    %144 = arith.select %142, %138, %119 : vector<8x32xi1>, vector<8x32xf32>
    %c5_i32 = arith.constant 5 : i32
    %c8_i32_38 = arith.constant 8 : i32
    %145 = arith.muli %c5_i32, %c8_i32_38 : i32
    %146 = tpu.assume_multiple %145, 8 : i32
    %147 = arith.index_cast %146 : i32 to index
    %c0_39 = arith.constant 0 : index
    %148 = vector.load %arg17[%147, %c0_39] : memref<64x128xf32, #tpu.memory_space<vmem>>, vector<8x128xf32>
    %cst_40 = arith.constant dense<0.000000e+00> : vector<8x128xf32>
    %149 = tpu.matmul %143, %18, %cst_40 {dimension_numbers = #tpu.dot_dimension_numbers<[1], [0], [0], [1], [0, 0, 1, 1], [], []>} : vector<8x32xf32>, vector<32x128xf32>, vector<8x128xf32> -> vector<8x128xf32>
    %150 = arith.addf %148, %149 : vector<8x128xf32>
    %151 = arith.negf %150 : vector<8x128xf32>
    %152 = math.exp %151 : vector<8x128xf32>
    %cst_41 = arith.constant 1.000000e+00 : f32
    %153 = vector.broadcast %cst_41 : f32 to vector<8x128xf32>
    %154 = arith.addf %153, %152 : vector<8x128xf32>
    %155 = arith.divf %153, %154 : vector<8x128xf32>
    %156 = math.tanh %150 : vector<8x128xf32>
    %157 = vector.extract_strided_slice %155 {offsets = [0, 0], sizes = [8, 32], strides = [1, 1]} : vector<8x128xf32> to vector<8x32xf32>
    %158 = vector.extract_strided_slice %155 {offsets = [0, 32], sizes = [8, 32], strides = [1, 1]} : vector<8x128xf32> to vector<8x32xf32>
    %159 = vector.extract_strided_slice %156 {offsets = [0, 64], sizes = [8, 32], strides = [1, 1]} : vector<8x128xf32> to vector<8x32xf32>
    %160 = vector.extract_strided_slice %155 {offsets = [0, 96], sizes = [8, 32], strides = [1, 1]} : vector<8x128xf32> to vector<8x32xf32>
    %161 = arith.mulf %158, %144 : vector<8x32xf32>
    %162 = arith.mulf %157, %159 : vector<8x32xf32>
    %163 = arith.addf %161, %162 : vector<8x32xf32>
    %164 = math.tanh %163 : vector<8x32xf32>
    %165 = arith.mulf %160, %164 : vector<8x32xf32>
    %166 = vector.broadcast %c5_i32 : i32 to vector<8x32xi32>
    %167 = arith.cmpi sgt, %17, %166 : vector<8x32xi32>
    %168 = arith.select %167, %165, %143 : vector<8x32xi1>, vector<8x32xf32>
    %169 = arith.select %167, %163, %144 : vector<8x32xi1>, vector<8x32xf32>
    %c6_i32 = arith.constant 6 : i32
    %c8_i32_42 = arith.constant 8 : i32
    %170 = arith.muli %c6_i32, %c8_i32_42 : i32
    %171 = tpu.assume_multiple %170, 8 : i32
    %172 = arith.index_cast %171 : i32 to index
    %c0_43 = arith.constant 0 : index
    %173 = vector.load %arg17[%172, %c0_43] : memref<64x128xf32, #tpu.memory_space<vmem>>, vector<8x128xf32>
    %cst_44 = arith.constant dense<0.000000e+00> : vector<8x128xf32>
    %174 = tpu.matmul %168, %18, %cst_44 {dimension_numbers = #tpu.dot_dimension_numbers<[1], [0], [0], [1], [0, 0, 1, 1], [], []>} : vector<8x32xf32>, vector<32x128xf32>, vector<8x128xf32> -> vector<8x128xf32>
    %175 = arith.addf %173, %174 : vector<8x128xf32>
    %176 = arith.negf %175 : vector<8x128xf32>
    %177 = math.exp %176 : vector<8x128xf32>
    %cst_45 = arith.constant 1.000000e+00 : f32
    %178 = vector.broadcast %cst_45 : f32 to vector<8x128xf32>
    %179 = arith.addf %178, %177 : vector<8x128xf32>
    %180 = arith.divf %178, %179 : vector<8x128xf32>
    %181 = math.tanh %175 : vector<8x128xf32>
    %182 = vector.extract_strided_slice %180 {offsets = [0, 0], sizes = [8, 32], strides = [1, 1]} : vector<8x128xf32> to vector<8x32xf32>
    %183 = vector.extract_strided_slice %180 {offsets = [0, 32], sizes = [8, 32], strides = [1, 1]} : vector<8x128xf32> to vector<8x32xf32>
    %184 = vector.extract_strided_slice %181 {offsets = [0, 64], sizes = [8, 32], strides = [1, 1]} : vector<8x128xf32> to vector<8x32xf32>
    %185 = vector.extract_strided_slice %180 {offsets = [0, 96], sizes = [8, 32], strides = [1, 1]} : vector<8x128xf32> to vector<8x32xf32>
    %186 = arith.mulf %183, %169 : vector<8x32xf32>
    %187 = arith.mulf %182, %184 : vector<8x32xf32>
    %188 = arith.addf %186, %187 : vector<8x32xf32>
    %189 = math.tanh %188 : vector<8x32xf32>
    %190 = arith.mulf %185, %189 : vector<8x32xf32>
    %191 = vector.broadcast %c6_i32 : i32 to vector<8x32xi32>
    %192 = arith.cmpi sgt, %17, %191 : vector<8x32xi32>
    %193 = arith.select %192, %190, %168 : vector<8x32xi1>, vector<8x32xf32>
    %194 = arith.select %192, %188, %169 : vector<8x32xi1>, vector<8x32xf32>
    %c7_i32 = arith.constant 7 : i32
    %c8_i32_46 = arith.constant 8 : i32
    %195 = arith.muli %c7_i32, %c8_i32_46 : i32
    %196 = tpu.assume_multiple %195, 8 : i32
    %197 = arith.index_cast %196 : i32 to index
    %c0_47 = arith.constant 0 : index
    %198 = vector.load %arg17[%197, %c0_47] : memref<64x128xf32, #tpu.memory_space<vmem>>, vector<8x128xf32>
    %cst_48 = arith.constant dense<0.000000e+00> : vector<8x128xf32>
    %199 = tpu.matmul %193, %18, %cst_48 {dimension_numbers = #tpu.dot_dimension_numbers<[1], [0], [0], [1], [0, 0, 1, 1], [], []>} : vector<8x32xf32>, vector<32x128xf32>, vector<8x128xf32> -> vector<8x128xf32>
    %200 = arith.addf %198, %199 : vector<8x128xf32>
    %201 = arith.negf %200 : vector<8x128xf32>
    %202 = math.exp %201 : vector<8x128xf32>
    %cst_49 = arith.constant 1.000000e+00 : f32
    %203 = vector.broadcast %cst_49 : f32 to vector<8x128xf32>
    %204 = arith.addf %203, %202 : vector<8x128xf32>
    %205 = arith.divf %203, %204 : vector<8x128xf32>
    %206 = math.tanh %200 : vector<8x128xf32>
    %207 = vector.extract_strided_slice %205 {offsets = [0, 0], sizes = [8, 32], strides = [1, 1]} : vector<8x128xf32> to vector<8x32xf32>
    %208 = vector.extract_strided_slice %205 {offsets = [0, 32], sizes = [8, 32], strides = [1, 1]} : vector<8x128xf32> to vector<8x32xf32>
    %209 = vector.extract_strided_slice %206 {offsets = [0, 64], sizes = [8, 32], strides = [1, 1]} : vector<8x128xf32> to vector<8x32xf32>
    %210 = vector.extract_strided_slice %205 {offsets = [0, 96], sizes = [8, 32], strides = [1, 1]} : vector<8x128xf32> to vector<8x32xf32>
    %211 = arith.mulf %208, %194 : vector<8x32xf32>
    %212 = arith.mulf %207, %209 : vector<8x32xf32>
    %213 = arith.addf %211, %212 : vector<8x32xf32>
    %214 = math.tanh %213 : vector<8x32xf32>
    %215 = arith.mulf %210, %214 : vector<8x32xf32>
    %216 = vector.broadcast %c7_i32 : i32 to vector<8x32xi32>
    %217 = arith.cmpi sgt, %17, %216 : vector<8x32xi32>
    %218 = arith.select %217, %215, %193 : vector<8x32xi1>, vector<8x32xf32>
    %219 = arith.select %217, %213, %194 : vector<8x32xi1>, vector<8x32xf32>
    %c8_i32_50 = arith.constant 8 : i32
    %c0_51 = arith.constant 0 : index
    %220 = memref.load %arg0[%c0_51] : memref<8xi32, #tpu.memory_space<smem>>
    %221 = arith.index_cast %220 : i32 to index
    %c0_52 = arith.constant 0 : index
    %222 = vector.load %arg9[%221, %c0_52] : memref<50x32xf32, #tpu.memory_space<vmem>>, vector<1x32xf32>
    %c1 = arith.constant 1 : index
    %223 = memref.load %arg0[%c1] : memref<8xi32, #tpu.memory_space<smem>>
    %224 = arith.index_cast %223 : i32 to index
    %c0_53 = arith.constant 0 : index
    %225 = vector.load %arg9[%224, %c0_53] : memref<50x32xf32, #tpu.memory_space<vmem>>, vector<1x32xf32>
    %c2 = arith.constant 2 : index
    %226 = memref.load %arg0[%c2] : memref<8xi32, #tpu.memory_space<smem>>
    %227 = arith.index_cast %226 : i32 to index
    %c0_54 = arith.constant 0 : index
    %228 = vector.load %arg9[%227, %c0_54] : memref<50x32xf32, #tpu.memory_space<vmem>>, vector<1x32xf32>
    %c3 = arith.constant 3 : index
    %229 = memref.load %arg0[%c3] : memref<8xi32, #tpu.memory_space<smem>>
    %230 = arith.index_cast %229 : i32 to index
    %c0_55 = arith.constant 0 : index
    %231 = vector.load %arg9[%230, %c0_55] : memref<50x32xf32, #tpu.memory_space<vmem>>, vector<1x32xf32>
    %c4 = arith.constant 4 : index
    %232 = memref.load %arg0[%c4] : memref<8xi32, #tpu.memory_space<smem>>
    %233 = arith.index_cast %232 : i32 to index
    %c0_56 = arith.constant 0 : index
    %234 = vector.load %arg9[%233, %c0_56] : memref<50x32xf32, #tpu.memory_space<vmem>>, vector<1x32xf32>
    %c5 = arith.constant 5 : index
    %235 = memref.load %arg0[%c5] : memref<8xi32, #tpu.memory_space<smem>>
    %236 = arith.index_cast %235 : i32 to index
    %c0_57 = arith.constant 0 : index
    %237 = vector.load %arg9[%236, %c0_57] : memref<50x32xf32, #tpu.memory_space<vmem>>, vector<1x32xf32>
    %c6 = arith.constant 6 : index
    %238 = memref.load %arg0[%c6] : memref<8xi32, #tpu.memory_space<smem>>
    %239 = arith.index_cast %238 : i32 to index
    %c0_58 = arith.constant 0 : index
    %240 = vector.load %arg9[%239, %c0_58] : memref<50x32xf32, #tpu.memory_space<vmem>>, vector<1x32xf32>
    %c7 = arith.constant 7 : index
    %241 = memref.load %arg0[%c7] : memref<8xi32, #tpu.memory_space<smem>>
    %242 = arith.index_cast %241 : i32 to index
    %c0_59 = arith.constant 0 : index
    %243 = vector.load %arg9[%242, %c0_59] : memref<50x32xf32, #tpu.memory_space<vmem>>, vector<1x32xf32>
    %244 = tpu.concatenate %222, %225, %228, %231, %234, %237, %240, %243 in 0 : vector<1x32xf32>, vector<1x32xf32>, vector<1x32xf32>, vector<1x32xf32>, vector<1x32xf32>, vector<1x32xf32>, vector<1x32xf32>, vector<1x32xf32> -> vector<8x32xf32>
    %c0_60 = arith.constant 0 : index
    %c0_61 = arith.constant 0 : index
    %245 = vector.load %arg10[%c0_60, %c0_61] : memref<32x32xf32, #tpu.memory_space<vmem>>, vector<32x32xf32>
    %cst_62 = arith.constant dense<0.000000e+00> : vector<8x32xf32>
    %246 = tpu.matmul %218, %245, %cst_62 {dimension_numbers = #tpu.dot_dimension_numbers<[1], [0], [0], [1], [0, 0, 1, 1], [], []>} : vector<8x32xf32>, vector<32x32xf32>, vector<8x32xf32> -> vector<8x32xf32>
    %247 = arith.addf %244, %246 : vector<8x32xf32>
    %c0_63 = arith.constant 0 : index
    %c0_64 = arith.constant 0 : index
    %248 = vector.load %arg11[%c0_63, %c0_64] : memref<1x32xf32, #tpu.memory_space<vmem>>, vector<1x32xf32>
    %249 = vector.broadcast %248 : vector<1x32xf32> to vector<8x32xf32>
    %250 = arith.addf %247, %249 : vector<8x32xf32>
    %251 = math.tanh %250 : vector<8x32xf32>
    %c0_65 = arith.constant 0 : index
    %c0_66 = arith.constant 0 : index
    %252 = vector.load %arg12[%c0_65, %c0_66] : memref<32x32xf32, #tpu.memory_space<vmem>>, vector<32x32xf32>
    %cst_67 = arith.constant dense<0.000000e+00> : vector<8x32xf32>
    %253 = tpu.matmul %251, %252, %cst_67 {dimension_numbers = #tpu.dot_dimension_numbers<[1], [0], [0], [1], [0, 0, 1, 1], [], []>} : vector<8x32xf32>, vector<32x32xf32>, vector<8x32xf32> -> vector<8x32xf32>
    %c0_68 = arith.constant 0 : index
    %c0_69 = arith.constant 0 : index
    %254 = vector.load %arg13[%c0_68, %c0_69] : memref<1x32xf32, #tpu.memory_space<vmem>>, vector<1x32xf32>
    %255 = vector.broadcast %254 : vector<1x32xf32> to vector<8x32xf32>
    %256 = arith.addf %253, %255 : vector<8x32xf32>
    %257 = math.tanh %256 : vector<8x32xf32>
    %c0_70 = arith.constant 0 : index
    %c0_71 = arith.constant 0 : index
    %258 = vector.load %arg14[%c0_70, %c0_71] : memref<32x1xf32, #tpu.memory_space<vmem>>, vector<32x1xf32>
    %cst_72 = arith.constant dense<0.000000e+00> : vector<8x1xf32>
    %259 = tpu.matmul %257, %258, %cst_72 {dimension_numbers = #tpu.dot_dimension_numbers<[1], [0], [0], [1], [0, 0, 1, 1], [], []>} : vector<8x32xf32>, vector<32x1xf32>, vector<8x1xf32> -> vector<8x1xf32>
    %c0_73 = arith.constant 0 : index
    %c0_74 = arith.constant 0 : index
    %260 = vector.load %arg15[%c0_73, %c0_74] : memref<1x1xf32, #tpu.memory_space<vmem>>, vector<1x1xf32>
    %261 = vector.broadcast %260 : vector<1x1xf32> to vector<8x1xf32>
    %262 = arith.addf %259, %261 : vector<8x1xf32>
    %c0_75 = arith.constant 0 : index
    %c0_76 = arith.constant 0 : index
    %263 = vector.load %arg16[%c0_75, %c0_76] : memref<8x1xf32, #tpu.memory_space<vmem>>, vector<8x1xf32>
    tpu.vector_store %arg16[%c0_75, %c0_76], %262 {strides = array<i32>} : memref<8x1xf32, #tpu.memory_space<vmem>>, vector<8x1xf32>,
    return
  }
}

</mosaic_0001>

<bundles_post_ra>
// kernel: msa_ef_forward.1
= control target key start
LH: loop header
LB: loop body
LE: loop exit
PB: predicated region body
PF: predicated region fallthrough
CT: control target
= control target key end

     0   :  { %s2739_s0 = inlined_call_operand.vmem [shape: s32[8], index: 0, kind: input, shape index: {}]   ;;  %s2740_s1 = inlined_call_operand.vmem [shape: f32[64,20], index: 1, kind: input, shape index: {}]   ;;  %s2741_s2 = inlined_call_operand.vmem [shape: f32[64,16], index: 2, kind: input, shape index: {}]   ;;  %s2742_s3 = inlined_call_operand.vmem [shape: s32[8,1], index: 3, kind: input, shape index: {}]   ;;  %s2743_s4 = inlined_call_operand.vmem [shape: s32[8,1], index: 4, kind: input, shape index: {}]   ;;  %s2744_s5 = inlined_call_operand.hbm [shape: f32[20,128], index: 5, kind: input, shape index: {}]   ;;  %s2745_s6 = inlined_call_operand.hbm [shape: f32[16,128], index: 6, kind: input, shape index: {}]   ;;  %s2746_s7 = inlined_call_operand.hbm [shape: f32[32,128], index: 7, kind: input, shape index: {}]   ;;  %s2747_s8 = inlined_call_operand.hbm [shape: f32[1,128], index: 8, kind: input, shape index: {}]   ;;  %s2748_s9 = inlined_call_operand.vmem [shape: f32[50,32], index: 9, kind: input, shape index: {}]   ;;  %s2749_s10 = inlined_call_operand.hbm [shape: f32[32,32], index: 10, kind: input, shape index: {}]   ;;  %s2750_s11 = inlined_call_operand.hbm [shape: f32[1,32], index: 11, kind: input, shape index: {}]   ;;  %s2751_s12 = inlined_call_operand.hbm [shape: f32[32,32], index: 12, kind: input, shape index: {}]   ;;  %s2752_s13 = inlined_call_operand.hbm [shape: f32[1,32], index: 13, kind: input, shape index: {}]   ;;  %s2753_s14 = inlined_call_operand.vmem [shape: f32[32,1], index: 14, kind: input, shape index: {}]   ;;  %s2754_s15 = inlined_call_operand.<no memory space> [shape: f32[1,1], index: 15, kind: input, shape index: {}]   ;;  %s2755_s16 = inlined_call_operand.vmem [shape: f32[8,1], index: 16, kind: output, shape index: {}]  }
   0x1   :  { %2756 = sst [smem:[#allocation25_spill]] %s2739_s0  ;;  %v21_v0 = vstv %s2754_s15 }
   0x2   :  { %22 = vst [vmem:[#allocation3] sm:$0x1] %v21_v0 }
   0x3   :  { %23 = vsyncpa [#allocation6], 0 }
   0x4   :  { %24 = vsyncpa [#allocation5], 0 }
   0x5   :  { %25 = vsyncpa [#allocation9], 0 }
   0x6   :  { %26 = vsyncpa [#allocation12], 0 }
   0x7   :  { %27 = vsyncpa [#allocation15], 0 }
   0x8   :  { %28 = vsyncpa [#allocation18], 0  ;;  %s2285_s23 = smov [#allocation8]   ;;  %s2286_s25 = smov [#allocation11]  }
   0x9   :  { %s64_s24 = sshll.u32 %s2285_s23, 4  ;;  %s89_s26 = sshll.u32 %s2286_s25, 4  ;;  %s65_s24 = int_to_ptr.vmem [resolvable:$true] %s64_s24  ;;  %s90_s26 = int_to_ptr.vmem [resolvable:$true] %s89_s26 }
   0xa   :  { %s2109_s27 = scalar_lea.vmem %s65_s24, 256  ;;  %p2114_p1 = scmp.lt.s32.totalorder %s65_s24, %s65_s24 }
   0xb   :  { %p2110_p0 = scmp.ne.s32.totalorder %s65_s24, %s2109_s27  ;;  %p2115_p2 = scmp.lt.s32.totalorder %s2109_s27, %s2109_s27 }
   0xd   :  { %p2116_p3 = por %p2115_p2, %p2114_p1 }
   0xf   :  { %p2117_p4 = pnand %p2116_p3, %p2110_p0 }
  0x11   :  { %2120 = shalt.err (!%p2117_p4)
}
  0x12   :  { %s2287_s15 = smov 128   ;;  %s2288_s28 = smov 8  }
  0x13   :  { %70 = dma.hbm_to_vmem [thread:$0]  %s2745_s6, 256, %s65_s24, [#allocation9], %s2287_s15, %s2287_s15, %s2288_s28  }
  0x14   :  { %s2129_s0 = scalar_lea.vmem %s90_s26, 16  ;;  %s2133_s17 = scalar_lea.vmem %s90_s26, 32 }
  0x15   :  { %p2130_p5 = scmp.ne.s32.totalorder %s90_s26, %s2129_s0  ;;  %p2134_p6 = scmp.lt.s32.totalorder %s90_s26, %s90_s26 }
  0x16   :  { %p2135_p7 = scmp.lt.s32.totalorder %s2133_s17, %s2129_s0 }
  0x18   :  { %p2136_p8 = por %p2135_p7, %p2134_p6 }
  0x1a   :  { %p2137_p9 = pnand %p2136_p8, %p2130_p5 }
  0x1c   :  { %2140 = shalt.err (!%p2137_p9)
}
  0x1d   :  { %92 = dma.hbm_to_vmem [thread:$0]  %s2747_s8, 16, %s90_s26, [#allocation12]  }
  0x1e   :  { %s2757_s22 = sld [smem:[#allocation25_spill]]  ;;  %s2289_s25 = smov [#allocation14]  }
  0x1f   :  { %s113_s27 = sshll.u32 %s2289_s25, 4  ;;  %s114_s27 = int_to_ptr.vmem [resolvable:$true] %s113_s27 }
  0x20   :  { %s2149_s6 = scalar_lea.vmem %s114_s27, 16  ;;  %s2153_s24 = scalar_lea.vmem %s114_s27, 32 }
  0x21   :  { %p2150_p10 = scmp.ne.s32.totalorder %s114_s27, %s2149_s6  ;;  %p2154_p11 = scmp.lt.s32.totalorder %s114_s27, %s114_s27 }
  0x22   :  { %p2155_p12 = scmp.lt.s32.totalorder %s2153_s24, %s2149_s6 }
  0x24   :  { %s35_s23 = sshll.u32 %s2757_s22, 4  ;;  %p2156_p13 = por %p2155_p12, %p2154_p11  ;;  %s36_s23 = int_to_ptr.vmem [resolvable:$true] %s35_s23 }
  0x26   :  { %p2157_p0 = pnand %p2156_p13, %p2150_p10 }
  0x28   :  { %2160 = shalt.err (!%p2157_p0)
}
  0x29   :  { %116 = dma.hbm_to_vmem [thread:$0]  %s2750_s11, 16, %s114_s27, [#allocation15]  }
  0x2a   :  { %s2161_s8 = scalar_lea.vmem %s36_s23, 16  ;;  %p2166_p2 = scmp.lt.s32.totalorder %s36_s23, %s36_s23 }
  0x2b   :  { %p2162_p1 = scmp.ne.s32.totalorder %s36_s23, %s2161_s8  ;;  %p2167_p3 = scmp.lt.s32.totalorder %s2161_s8, %s2161_s8 }
  0x2d   :  { %p2168_p4 = por %p2167_p3, %p2166_p2 }
  0x2f   :  { %p2169_p5 = pnand %p2168_p4, %p2162_p1 }
  0x31   :  { %2172 = shalt.err (!%p2169_p5)
}
  0x32   :  { %s2290_s26 = smov [#allocation4]   ;;  %s2291_s0 = smov [#allocation7]  }
  0x33   :  { %38 = dma.vmem_to_smem %s36_s23, 16, %s2290_s26, [#allocation6]  }
  0x34   :  { %s52_s17 = sshll.u32 %s2291_s0, 4  ;;  %s2292_s18 = smov [#allocation10]   ;;  %s53_s17 = int_to_ptr.vmem [resolvable:$true] %s52_s17 }
  0x35   :  { %s76_s19 = sshll.u32 %s2292_s18, 4  ;;  %s2181_s20 = scalar_lea.vmem %s53_s17, 384  ;;  %s77_s19 = int_to_ptr.vmem [resolvable:$true] %s76_s19 }
  0x36   :  { %p2182_p6 = scmp.ne.s32.totalorder %s53_s17, %s2181_s20  ;;  %p2186_p7 = scmp.lt.s32.totalorder %s53_s17, %s53_s17 }
  0x37   :  { %p2187_p8 = scmp.lt.s32.totalorder %s2181_s20, %s2181_s20 }
  0x39   :  { %p2188_p9 = por %p2187_p8, %p2186_p7 }
  0x3b   :  { %p2189_p10 = pnand %p2188_p9, %p2182_p6 }
  0x3d   :  { %2192 = shalt.err (!%p2189_p10)
}
  0x3e   :  { %58 = dma.hbm_to_vmem [thread:$0]  %s2744_s5, 384, %s53_s17, [#allocation5], %s2287_s15, %s2287_s15, %s2288_s28  }
  0x3f   :  { %s2201_s22 = scalar_lea.vmem %s77_s19, 512  ;;  %p2206_p12 = scmp.lt.s32.totalorder %s77_s19, %s77_s19 }
  0x40   :  { %p2202_p11 = scmp.ne.s32.totalorder %s77_s19, %s2201_s22  ;;  %p2207_p13 = scmp.lt.s32.totalorder %s2201_s22, %s2201_s22 }
  0x42   :  { %p2208_p0 = por %p2207_p13, %p2206_p12 }
  0x44   :  { %p2209_p1 = pnand %p2208_p0, %p2202_p11 }
  0x46   :  { %2212 = shalt.err (!%p2209_p1)
}
  0x47   :  { %82 = dma.hbm_to_vmem [thread:$0]  %s2746_s7, 512, %s77_s19, [#allocation9], %s2287_s15, %s2287_s15, %s2288_s28  }
  0x48   :  { %s2293_s27 = smov [#allocation13]   ;;  %s2294_s24 = smov [#allocation16]  }
  0x49   :  { %s100_s6 = sshll.u32 %s2293_s27, 4  ;;  %s122_s29 = sshll.u32 %s2294_s24, 4  ;;  %s101_s6 = int_to_ptr.vmem [resolvable:$true] %s100_s6  ;;  %s123_s29 = int_to_ptr.vmem [resolvable:$true] %s122_s29 }
  0x4a   :  { %s2221_s5 = scalar_lea.vmem %s101_s6, 512  ;;  %p2226_p3 = scmp.lt.s32.totalorder %s101_s6, %s101_s6 }
  0x4b   :  { %p2222_p2 = scmp.ne.s32.totalorder %s101_s6, %s2221_s5  ;;  %p2227_p4 = scmp.lt.s32.totalorder %s2221_s5, %s2221_s5 }
  0x4d   :  { %p2228_p5 = por %p2227_p4, %p2226_p3 }
  0x4f   :  { %p2229_p6 = pnand %p2228_p5, %p2222_p2 }
  0x51   :  { %2232 = shalt.err (!%p2229_p6)
}
  0x52   :  { %106 = dma.hbm_to_vmem [thread:$0]  %s2749_s10, 512, %s101_s6, [#allocation12], %s2287_s15, %s2287_s15, %s2288_s28  }
  0x53   :  { %s2241_s7 = scalar_lea.vmem %s123_s29, 512  ;;  %p2246_p8 = scmp.lt.s32.totalorder %s123_s29, %s123_s29 }
  0x54   :  { %p2242_p7 = scmp.ne.s32.totalorder %s123_s29, %s2241_s7  ;;  %p2247_p9 = scmp.lt.s32.totalorder %s2241_s7, %s2241_s7 }
  0x56   :  { %p2248_p10 = por %p2247_p9, %p2246_p8 }
  0x58   :  { %p2249_p11 = pnand %p2248_p10, %p2242_p7 }
  0x5a   :  { %2252 = shalt.err (!%p2249_p11)
}
  0x5b   :  { %128 = dma.hbm_to_vmem [thread:$0]  %s2751_s12, 512, %s123_s29, [#allocation15], %s2287_s15, %s2287_s15, %s2288_s28  }
  0x5c   :  { %s2295_s17 = smov [#allocation17]  }
  0x5d   :  { %s135_s18 = sshll.u32 %s2295_s17, 4  ;;  %s136_s18 = int_to_ptr.vmem [resolvable:$true] %s135_s18 }
  0x5e   :  { %s2261_s19 = scalar_lea.vmem %s136_s18, 16  ;;  %s2265_s10 = scalar_lea.vmem %s136_s18, 32 }
  0x5f   :  { %p2262_p12 = scmp.ne.s32.totalorder %s136_s18, %s2261_s19  ;;  %p2266_p13 = scmp.lt.s32.totalorder %s136_s18, %s136_s18 }
  0x60   :  { %p2267_p0 = scmp.lt.s32.totalorder %s2265_s10, %s2261_s19 }
  0x62   :  { %p2268_p1 = por %p2267_p0, %p2266_p13 }
  0x64   :  { %p2269_p2 = pnand %p2268_p1, %p2262_p12 }
  0x66   :  { %2272 = shalt.err (!%p2269_p2)
}
  0x67   :  { %138 = dma.hbm_to_vmem [thread:$0]  %s2752_s13, 16, %s136_s18, [#allocation18]  }
  0x68   :  { %2273 = dma.done.wait [#allocation6], 16  }
  0x69   :  { %2274 = vsyncadd [#allocation6], 4294967280 }
  0x6a   :  { %2275 = dma.done.wait [#allocation5], 384  }
  0x6b   :  { %2276 = vsyncadd [#allocation5], 4294966912 }
  0x6c   :  { %2277 = dma.done.wait [#allocation9], 768  }
  0x6d   :  { %2278 = vsyncadd [#allocation9], 4294966528 }
  0x6e   :  { %2279 = dma.done.wait [#allocation12], 528  }
  0x6f   :  { %2280 = vsyncadd [#allocation12], 4294966768 }
  0x70   :  { %2281 = dma.done.wait [#allocation15], 528  }
  0x71   :  { %2282 = vsyncadd [#allocation15], 4294966768 }
  0x72   :  { %2283 = dma.done.wait [#allocation18], 16  }
  0x73   :  { %2284 = vsyncadd [#allocation18], 4294967280 }
  0x74   :  { %170 = sfence }
  0x75   :  { %v191_v1 = vld [vmem:[#allocation8 + $0x8] sm:$0xff]  ;;  %v181_v2 = vld [vmem:[#allocation7 + $0x10] sm:$0xf]  ;;  %vm347_vm0 = vcmask 1043456   ;;  %v190_v3 = vld [vmem:[#allocation8] sm:$0xff]  ;;  %vm192_vm1 = vcmask 130048  }
  0x76   :  { %1859 = vmatprep.subr.mxu0 %v191_v1  ;;  %1875 = vmatprep.subr.msk.mxu1 %vm347_vm0, %v181_v2  ;;  %v180_v4 = vld [vmem:[#allocation7 + $0x8] sm:$0xff]  ;;  %v182_v5 = vld [vmem:[%s2741_s2] sm:$0xff]  ;;  %vm322_vm2 = vcmask 162816   ;;  %v2296_v11 = vmov 0.0   ;;  %v185_v13 = vld [vmem:[%s2741_s2 + $0x18] sm:$0xff]  ;;  %vm2297_vm3 = vmmov 0  }
  0x77   :  { %1860 = vmatpush3.msra.mxu0 %v191_v1  ;;  %1876 = vmatpush3.msk.msra.mxu1 %vm347_vm0, %v181_v2  ;;  %v183_v6 = vld [vmem:[%s2741_s2 + $0x8] sm:$0xff]  ;;  %v171_v8 = vld [vmem:[%s2740_s1] sm:$0xff]  ;;  %v184_v12 = vld [vmem:[%s2741_s2 + $0x10] sm:$0xff]  ;;  %s2301_s5 = smov 96   ;;  %vm493_vm4 = vcmask 261120   ;;  %s1403_s30 = sld [smem:[#allocation4]] }
  0x78   :  { %1861 = vmatprep.subr.mxu0 %v190_v3  ;;  %1877 = vmatprep.subr.mxu1 %v180_v4  ;;  %v179_v7 = vld [vmem:[#allocation7] sm:$0xff]  ;;  %v173_v14 = vld [vmem:[%s2740_s1 + $0x10] sm:$0xff]  ;;  %v2463_v15 = vld [vmem:[#allocation10 + $0x10] sm:$0xff]  ;;  %s1772_s8 = sld [smem:[#allocation4 + $0x3]]  ;;  %vm1448_vm13 = vcmask 1040384   ;;  %vm1450_vm14 = vcmask 1041408  }
  0x79   :  { %1862 = vmatpush3.msra.mxu0 %v190_v3  ;;  %1863 = vmatprep.mubr.msk.f32.mxu0 %vm192_vm1, %v182_v5  ;;  %v2445_v9 = vld [vmem:[#allocation10 + $0x18] sm:$0xff]  ;;  %v174_v17 = vld [vmem:[%s2740_s1 + $0x18] sm:$0xff]  ;;  %v188_v21 = vld [vmem:[%s2741_s2 + $0x30] sm:$0xff]  ;;  %s1773_s17 = sld [smem:[#allocation4 + $0x4]]  ;;  %vm1452_vm15 = vcmask 1042432  }
  0x7a   :  { %1878 = vmatpush3.msra.mxu1 %v180_v4  ;;  %1864 = vmatmul.mubr.msk.f32.vlgmr.msra.gmra.mxu0 %vm192_vm1, %v183_v6  ;;  %v172_v10 = vld [vmem:[%s2740_s1 + $0x8] sm:$0xff]  ;;  %v186_v16 = vld [vmem:[%s2741_s2 + $0x20] sm:$0xff]  ;;  %v2478_v19 = vld [vmem:[#allocation10 + $0x8] sm:$0xff]  ;;  %v2300_v6 = vmov 0   ;;  %s1774_s13 = sld [smem:[#allocation4 + $0x5]] }
  0x7b   :  { %1879 = vmatprep.subr.mxu1 %v179_v7  ;;  %1893 = vmatprep.subr.mxu0 %v2296_v11  ;;  %v175_v18 = vld [vmem:[%s2740_s1 + $0x20] sm:$0xff]  ;;  %v187_v20 = vld [vmem:[%s2741_s2 + $0x28] sm:$0xff]  ;;  %v177_v24 = vld [vmem:[%s2740_s1 + $0x30] sm:$0xff]  ;;  %s1775_s22 = sld [smem:[#allocation4 + $0x6]] }
  0x7c   :  { %1880 = vmatpush3.msra.mxu1 %v179_v7  ;;  %1881 = vmatprep.mubr.msk.f32.mxu1 %vm322_vm2, %v171_v8  ;;  %v2490_v22 = vld [vmem:[#allocation10] sm:$0xff]  ;;  %v189_v25 = vld [vmem:[%s2741_s2 + $0x38] sm:$0xff]  ;;  %s2299_s2 = smov 32   ;;  %v483_v7 = vld [vmem:[%s2743_s4] sm:$0xff]  ;;  %s1771_s4 = sld [smem:[#allocation4 + $0x2]] }
  0x7d   :  { %1894 = vmatpush3.msra.mxu0 %v2445_v9  ;;  %1882 = vmatmul.mubr.msk.f32.vlgmr.msra.gmra.mxu1 %vm322_vm2, %v172_v10  ;;  %v176_v23 = vld [vmem:[%s2740_s1 + $0x28] sm:$0xff]  ;;  %v178_v26 = vld [vmem:[%s2740_s1 + $0x38] sm:$0xff]  ;;  %s2298_s1 = smov 64   ;;  %s1404_s12 = scalar_lea.vmem %s2748_s9, %s1403_s30 }
  0x7e   :  { %1866 = vmatprep.mubr.msk.f32.mxu0 %vm192_vm1, %v184_v12  ;;  %1895 = vmatprep.subr.mxu0 %v2296_v11  ;;  %v1754_v30 = vld [vmem:[#allocation11] ss:$0 sm:$0xff]  ;;  %s1413_s21 = scalar_lea.vmem %s2748_s9, %s1772_s8 }
  0x7f   :  { %1867 = vmatmul.mubr.msk.f32.gmra.mxu0 %vm192_vm1, %v185_v13  ;;  %1884 = vmatprep.mubr.msk.f32.mxu1 %vm322_vm2, %v173_v14  ;;  %v479_v14 = vld [vmem:[%s2742_s3] sm:$0xff]  ;;  %s1770_s3 = sld [smem:[#allocation4 + $0x1]] }
  0x80   :  { %1896 = vmatpush3.msra.mxu0 %v2463_v15  ;;  %1869 = vmatprep.mubr.msk.f32.mxu0 %vm192_vm1, %v186_v16  ;;  %s1419_s24 = scalar_lea.vmem %s2748_s9, %s1774_s13 }
  0x81   :  { %1885 = vmatmul.mubr.msk.f32.gmra.mxu1 %vm322_vm2, %v174_v17  ;;  %1897 = vmatprep.subr.mxu0 %v2296_v11 }
  0x82   :  { %1887 = vmatprep.mubr.msk.f32.mxu1 %vm322_vm2, %v175_v18  ;;  %1898 = vmatpush3.msra.mxu0 %v2478_v19  ;;  %s1410_s10 = scalar_lea.vmem %s2748_s9, %s1771_s4 }
  0x83   :  { %1870 = vmatmul.mubr.msk.f32.gmra.mxu0 %vm192_vm1, %v187_v20  ;;  %1899 = vmatprep.subr.mxu0 %v2296_v11 }
  0x84   :  { %1872 = vmatprep.mubr.msk.f32.mxu0 %vm192_vm1, %v188_v21  ;;  %1900 = vmatpush3.msra.mxu0 %v2490_v22 }
  0x85   :  { %1888 = vmatmul.mubr.msk.f32.gmra.mxu1 %vm322_vm2, %v176_v23  ;;  %1904 = vmatprep.subr.mxu1 %v2296_v11  ;;  %s1407_s0 = scalar_lea.vmem %s2748_s9, %s1770_s3  ;;  %s1422_s3 = scalar_lea.vmem %s2748_s9, %s1775_s22 }
  0x86   :  { %1890 = vmatprep.mubr.msk.f32.mxu1 %vm322_vm2, %v177_v24  ;;  %1905 = vmatpush3.msra.mxu1 %v2445_v9 }
  0x87   :  { %1873 = vmatmul.mubr.msk.f32.gmra.mxu0 %vm192_vm1, %v189_v25  ;;  %1906 = vmatprep.subr.mxu1 %v2296_v11 }
  0x88   :  { %1901 = vmatprep.mubr.msk.f32.mxu0 %vm2297_vm3, %v2296_v11  ;;  %1907 = vmatpush3.msra.mxu1 %v2463_v15 }
  0x89   :  { %1891 = vmatmul.mubr.msk.f32.gmra.mxu1 %vm322_vm2, %v178_v26  ;;  %1908 = vmatprep.subr.mxu1 %v2296_v11  ;;  %vm1457_vm2 = vcmask 1045504  }
  0x8a   :  { %1909 = vmatpush3.msra.mxu1 %v2478_v19  ;;  %1912 = vmatprep.mubr.msk.f32.mxu1 %vm2297_vm3, %v2296_v11 }
  0x8b   :  { %1902 = vmatmul.mubr.f32.vlgmr.msra.gmra.mxu0 %v2296_v11  ;;  %1910 = vmatprep.subr.mxu1 %v2296_v11 }
  0x8c   :  { %1911 = vmatpush3.msra.mxu1 %v2490_v22  ;;  %1915 = vmatprep.subr.mxu0 %v2296_v11 }
  0x8d   :  { %1916 = vmatpush3.msra.mxu0 %v2445_v9  ;;  %1923 = vmatprep.mubr.msk.f32.mxu0 %vm2297_vm3, %v2296_v11 }
  0x8e   :  { %1917 = vmatprep.subr.mxu0 %v2296_v11  ;;  %1926 = vmatprep.subr.mxu1 %v2296_v11 }
  0x8f   :  { %1918 = vmatpush3.msra.mxu0 %v2463_v15  ;;  %2031 = vset.pattern.permute.xlu1 %v2300_v6 }
  0x90   :  { %1919 = vmatprep.subr.mxu0 %v2296_v11  ;;  %2032 = vset.pattern.permute.xlu0 %v2300_v6 }
  0x91   :  { %1920 = vmatpush3.msra.mxu0 %v2478_v19 }
  0x92   :  { %1921 = vmatprep.subr.mxu0 %v2296_v11 }
  0x93   :  { %1922 = vmatpush3.msra.mxu0 %v2490_v22 }
  0x94   :  { %1937 = vmatprep.subr.mxu0 %v2296_v11 }
 0x13a   :  { %v1865_v27 = vpop.f32.mrf.mxu0 }
 0x13c   :  { %v283_v28 = vpop.f32.mrf.mxu0 }
 0x13d   :  { %v1883_v29 = vpop.f32.mrf.mxu1 }
 0x13e   :  { %v423_v31 = vadd.f32 %v1883_v29, %v1865_v27 }
 0x13f   :  { %v1868_v32 = vpop.f32.mrf.mxu0  ;;  %v417_v33 = vpop.f32.mrf.mxu1 }
 0x140   :  { %v2539_v34 = vadd.f32 %v1754_v30, %v423_v31  ;;  %v418_v44 = vadd.f32 %v417_v33, %v283_v28 }
 0x141   :  { %v293_v35 = vpop.f32.mrf.mxu0  ;;  %v1886_v36 = vpop.f32.mrf.mxu1 }
 0x142   :  { %v433_v37 = vadd.f32 %v1886_v36, %v1868_v32  ;;  %v463_v54 = vadd.f32 %v1754_v30, %v418_v44 }
 0x143   :  { %v1871_v38 = vpop.f32.mrf.mxu0  ;;  %v427_v39 = vpop.f32.mrf.mxu1 }
 0x144   :  { %v428_v40 = vadd.f32 %v427_v39, %v293_v35  ;;  %v2541_v41 = vadd.f32 %v1754_v30, %v433_v37 }
 0x145   :  { %v303_v42 = vpop.f32.mrf.mxu0  ;;  %v1889_v43 = vpop.f32.mrf.mxu1 }
 0x146   :  { %v443_v45 = vadd.f32 %v1889_v43, %v1871_v38  ;;  %v2543_v46 = vadd.f32 %v1754_v30, %v428_v40 }
 0x147   :  { %v1874_v47 = vpop.f32.mrf.mxu0  ;;  %v437_v48 = vpop.f32.mrf.mxu1 }
 0x148   :  { %v438_v49 = vadd.f32 %v437_v48, %v303_v42  ;;  %v2545_v50 = vadd.f32 %v1754_v30, %v443_v45 }
 0x149   :  { %v313_v51 = vpop.f32.mrf.mxu0  ;;  %v1892_v52 = vpop.f32.mrf.mxu1 }
 0x14a   :  { %v453_v53 = vadd.f32 %v1892_v52, %v1874_v47  ;;  %v2547_v55 = vadd.f32 %v1754_v30, %v438_v49 }
 0x14b   :  { %v447_v56 = vpop.f32.mrf.mxu1  ;;  %v563_v57 = vpop.f32.mrf.mxu0 }
 0x14c   :  { %v448_v58 = vadd.f32 %v447_v56, %v313_v51  ;;  %v567_v59 = vadd.f32 %v563_v57, %v463_v54  ;;  %v2549_v60 = vadd.f32 %v1754_v30, %v453_v53 }
 0x14d   :  { %v1903_v61 = vpop.f32.mrf.mxu0 }
 0x14e   :  { %2033 = vtanh.f32 %v567_v59  ;;  %v2551_v62 = vadd.f32 %v1754_v30, %v448_v58  ;;  %v1755_v0 = vmul.f32 -1.442695, %v567_v59 }
 0x150   :  { %2035 = vpow2.f32 %v1755_v0 }
 0x15b   :  { %v2034_v63 = vpop.eup %2033 }
 0x15c   :  { %577 = vrot.lane.b32.xlu0 %v2034_v63, %s2298_s1 }
 0x15d   :  { %v2036_v1 = vpop.eup %2035 }
 0x15e   :  { %v571_v2 = vadd.f32 1.0, %v2036_v1 }
 0x160   :  { %2037 = vrcp.f32 %v571_v2 }
 0x16d   :  { %v2038_v3 = vpop.eup %2037 }
 0x16e   :  { %v575_v8 = vmul.f32 0.0, %v2038_v3 }
 0x1ce   :  { %v578_v4 = vpop.permute.xlu0 %577 }
 0x1cf   :  { %v580_v5 = vmul.f32 %v2038_v3, %v578_v4 }
 0x1d1   :  { %582 = vrot.lane.b32.xlu0 %v580_v5, %s2299_s2 }
 0x1d5   :  { %485 = vperm.xlu0 %2032, %v483_v7  }
 0x243   :  { %v583_v10 = vpop.permute.xlu0 %582 }
 0x244   :  { %v585_v12 = vadd.f32 %v583_v10, %v575_v8 }
 0x246   :  { %2039 = vtanh.f32 %v585_v12 }
 0x250   :  { %v486_v20 = vpop.permute.xlu0 %485 }
 0x253   :  { %v2040_v13 = vpop.eup %2039 }
 0x254   :  { %588 = vrot.lane.b32.xlu1 %v2040_v13, %s2298_s1 }
 0x258   :  { %481 = vperm.xlu1 %2031, %v479_v14  }
 0x2c6   :  { %v589_v16 = vpop.permute.xlu1 %588 }
 0x2c7   :  { %v591_v17 = vmul.f32 %v2038_v3, %v589_v16 }
 0x2c9   :  { %594 = vrot.lane.b32.xlu1 %v591_v17, %s2299_s2 }
 0x2cd   :  { %599 = vrot.lane.b32.xlu1 %v585_v12, %s2301_s5 }
 0x2d3   :  { %v482_v18 = vpop.permute.xlu1 %481 }
 0x2d4   :  { %v2565_v21 = vsel %vm192_vm1, %v482_v18, %v486_v20  ;;  %vm1455_vm1 = vcmask 1044480  }
 0x2d5   :  { %vm592_vm5 = vcmp.gt.s32.totalorder %v2565_v21, 0  ;;  %vm707_vm6 = vcmp.gt.s32.totalorder %v2565_v21, 1  ;;  %vm822_vm7 = vcmp.gt.s32.totalorder %v2565_v21, 2  ;;  %vm937_vm8 = vcmp.gt.s32.totalorder %v2565_v21, 3 }
 0x2d6   :  { %vm1052_vm9 = vcmp.gt.s32.totalorder %v2565_v21, 4  ;;  %vm1167_vm10 = vcmp.gt.s32.totalorder %v2565_v21, 5  ;;  %vm1282_vm11 = vcmp.gt.s32.totalorder %v2565_v21, 6  ;;  %vm1397_vm12 = vcmp.gt.s32.totalorder %v2565_v21, 7  ;;  %v1408_v21 = vld [vmem:[%s1407_s0] sm:$0x1] }
 0x33b   :  { %v595_v23 = vpop.permute.xlu1 %594 }
 0x33c   :  { %v597_v24 = vsel %vm592_vm5, %v595_v23, 0.0 }
 0x33d   :  { %1913 = vmatmul.mubr.msk.f32.vlgmr.msra.gmra.mxu1 %vm493_vm4, %v597_v24 }
 0x33e   :  { %1927 = vmatpush3.msra.mxu1 %v2445_v9  ;;  %1934 = vmatprep.mubr.msk.f32.mxu1 %vm2297_vm3, %v2296_v11 }
 0x33f   :  { %v600_v25 = vpop.permute.xlu1 %599  ;;  %1928 = vmatprep.subr.mxu1 %v2296_v11 }
 0x340   :  { %v602_v26 = vsel %vm592_vm5, %v600_v25, 0.0  ;;  %1929 = vmatpush3.msra.mxu1 %v2463_v15 }
 0x341   :  { %687 = vrot.lane.b32.xlu1 %v602_v26, %s2299_s2  ;;  %1930 = vmatprep.subr.mxu1 %v2296_v11 }
 0x342   :  { %1931 = vmatpush3.msra.mxu1 %v2478_v19 }
 0x343   :  { %1932 = vmatprep.subr.mxu1 %v2296_v11 }
 0x344   :  { %1933 = vmatpush3.msra.mxu1 %v2490_v22 }
 0x345   :  { %1948 = vmatprep.subr.mxu1 %v2296_v11 }
 0x3b3   :  { %v688_v38 = vpop.permute.xlu1 %687 }
 0x3fd   :  { %v674_v27 = vpop.f32.mrf.mxu1 }
 0x3fe   :  { %v678_v28 = vadd.f32 %v674_v27, %v2539_v34 }
 0x3ff   :  { %v1914_v29 = vpop.f32.mrf.mxu1 }
 0x400   :  { %2041 = vtanh.f32 %v678_v28  ;;  %v1757_v31 = vmul.f32 -1.442695, %v678_v28 }
 0x402   :  { %2043 = vpow2.f32 %v1757_v31 }
 0x40d   :  { %v2042_v30 = vpop.eup %2041 }
 0x40e   :  { %692 = vrot.lane.b32.xlu0 %v2042_v30, %s2298_s1 }
 0x40f   :  { %v2044_v32 = vpop.eup %2043 }
 0x410   :  { %v682_v33 = vadd.f32 1.0, %v2044_v32 }
 0x412   :  { %2045 = vrcp.f32 %v682_v33 }
 0x41f   :  { %v2046_v35 = vpop.eup %2045 }
 0x420   :  { %v690_v39 = vmul.f32 %v2046_v35, %v688_v38 }
 0x480   :  { %v693_v36 = vpop.permute.xlu0 %692 }
 0x481   :  { %v695_v37 = vmul.f32 %v2046_v35, %v693_v36 }
 0x483   :  { %697 = vrot.lane.b32.xlu0 %v695_v37, %s2299_s2 }
 0x4f5   :  { %v698_v40 = vpop.permute.xlu0 %697 }
 0x4f6   :  { %v700_v42 = vadd.f32 %v698_v40, %v690_v39 }
 0x4f8   :  { %2047 = vtanh.f32 %v700_v42 }
 0x505   :  { %v2048_v34 = vpop.eup %2047 }
 0x506   :  { %703 = vrot.lane.b32.xlu1 %v2048_v34, %s2298_s1 }
 0x50a   :  { %714 = vrot.lane.b32.xlu1 %v700_v42, %s2301_s5 }
 0x578   :  { %v704_v43 = vpop.permute.xlu1 %703 }
 0x579   :  { %v706_v44 = vmul.f32 %v2046_v35, %v704_v43 }
 0x57b   :  { %709 = vrot.lane.b32.xlu0 %v706_v44, %s2299_s2 }
 0x57c   :  { %v715_v45 = vpop.permute.xlu1 %714 }
 0x57d   :  { %v717_v47 = vsel %vm707_vm6, %v715_v45, %v602_v26 }
 0x57e   :  { %802 = vrot.lane.b32.xlu1 %v717_v47, %s2299_s2 }
 0x5ed   :  { %v710_v48 = vpop.permute.xlu0 %709 }
 0x5ee   :  { %v712_v49 = vsel %vm707_vm6, %v710_v48, %v597_v24 }
 0x5ef   :  { %1924 = vmatmul.mubr.msk.f32.vlgmr.msra.gmra.mxu0 %vm493_vm4, %v712_v49 }
 0x5f0   :  { %1938 = vmatpush3.msra.mxu0 %v2445_v9  ;;  %1945 = vmatprep.mubr.msk.f32.mxu0 %vm2297_vm3, %v2296_v11  ;;  %v803_v0 = vpop.permute.xlu1 %802 }
 0x5f1   :  { %1939 = vmatprep.subr.mxu0 %v2296_v11 }
 0x5f2   :  { %1940 = vmatpush3.msra.mxu0 %v2463_v15 }
 0x5f3   :  { %1941 = vmatprep.subr.mxu0 %v2296_v11 }
 0x5f4   :  { %1942 = vmatpush3.msra.mxu0 %v2478_v19 }
 0x5f5   :  { %1943 = vmatprep.subr.mxu0 %v2296_v11 }
 0x5f6   :  { %1944 = vmatpush3.msra.mxu0 %v2490_v22 }
 0x5f7   :  { %1959 = vmatprep.subr.mxu0 %v2296_v11 }
 0x6af   :  { %v789_v51 = vpop.f32.mrf.mxu0 }
 0x6b0   :  { %v793_v52 = vadd.f32 %v789_v51, %v2543_v46 }
 0x6b1   :  { %v1925_v53 = vpop.f32.mrf.mxu0 }
 0x6b2   :  { %2049 = vtanh.f32 %v793_v52  ;;  %v1759_v56 = vmul.f32 -1.442695, %v793_v52 }
 0x6b4   :  { %2051 = vpow2.f32 %v1759_v56 }
 0x6bf   :  { %v2050_v54 = vpop.eup %2049 }
 0x6c0   :  { %807 = vrot.lane.b32.xlu0 %v2050_v54, %s2298_s1 }
 0x6c1   :  { %v2052_v57 = vpop.eup %2051 }
 0x6c2   :  { %v797_v58 = vadd.f32 1.0, %v2052_v57 }
 0x6c4   :  { %2053 = vrcp.f32 %v797_v58 }
 0x6d1   :  { %v2054_v59 = vpop.eup %2053 }
 0x6d2   :  { %v805_v1 = vmul.f32 %v2054_v59, %v803_v0 }
 0x732   :  { %v808_v61 = vpop.permute.xlu0 %807 }
 0x733   :  { %v810_v63 = vmul.f32 %v2054_v59, %v808_v61 }
 0x735   :  { %812 = vrot.lane.b32.xlu0 %v810_v63, %s2299_s2 }
 0x7a7   :  { %v813_v2 = vpop.permute.xlu0 %812 }
 0x7a8   :  { %v815_v3 = vadd.f32 %v813_v2, %v805_v1 }
 0x7aa   :  { %2055 = vtanh.f32 %v815_v3 }
 0x7b7   :  { %v2056_v46 = vpop.eup %2055 }
 0x7b8   :  { %818 = vrot.lane.b32.xlu1 %v2056_v46, %s2298_s1 }
 0x7bc   :  { %829 = vrot.lane.b32.xlu1 %v815_v3, %s2301_s5 }
 0x82a   :  { %v819_v4 = vpop.permute.xlu1 %818 }
 0x82b   :  { %v821_v5 = vmul.f32 %v2054_v59, %v819_v4 }
 0x82d   :  { %824 = vrot.lane.b32.xlu0 %v821_v5, %s2299_s2 }
 0x82e   :  { %v830_v6 = vpop.permute.xlu1 %829 }
 0x82f   :  { %v832_v7 = vsel %vm822_vm7, %v830_v6, %v717_v47 }
 0x830   :  { %917 = vrot.lane.b32.xlu1 %v832_v7, %s2299_s2 }
 0x89f   :  { %v825_v8 = vpop.permute.xlu0 %824 }
 0x8a0   :  { %v827_v10 = vsel %vm822_vm7, %v825_v8, %v712_v49 }
 0x8a1   :  { %1935 = vmatmul.mubr.msk.f32.vlgmr.msra.gmra.mxu1 %vm493_vm4, %v827_v10 }
 0x8a2   :  { %1949 = vmatpush3.msra.mxu1 %v2445_v9  ;;  %1956 = vmatprep.mubr.msk.f32.mxu1 %vm2297_vm3, %v2296_v11  ;;  %v918_v26 = vpop.permute.xlu1 %917 }
 0x8a3   :  { %1950 = vmatprep.subr.mxu1 %v2296_v11 }
 0x8a4   :  { %1951 = vmatpush3.msra.mxu1 %v2463_v15 }
 0x8a5   :  { %1952 = vmatprep.subr.mxu1 %v2296_v11 }
 0x8a6   :  { %1953 = vmatpush3.msra.mxu1 %v2478_v19 }
 0x8a7   :  { %1954 = vmatprep.subr.mxu1 %v2296_v11 }
 0x8a8   :  { %1955 = vmatpush3.msra.mxu1 %v2490_v22 }
 0x8a9   :  { %1970 = vmatprep.subr.mxu1 %v2296_v11 }
 0x961   :  { %v904_v12 = vpop.f32.mrf.mxu1 }
 0x962   :  { %v908_v13 = vadd.f32 %v904_v12, %v2541_v41 }
 0x963   :  { %v1936_v14 = vpop.f32.mrf.mxu1 }
 0x964   :  { %2057 = vtanh.f32 %v908_v13  ;;  %v1761_v17 = vmul.f32 -1.442695, %v908_v13 }
 0x966   :  { %2059 = vpow2.f32 %v1761_v17 }
 0x971   :  { %v2058_v16 = vpop.eup %2057 }
 0x972   :  { %922 = vrot.lane.b32.xlu0 %v2058_v16, %s2298_s1 }
 0x973   :  { %v2060_v18 = vpop.eup %2059 }
 0x974   :  { %v912_v20 = vadd.f32 1.0, %v2060_v18 }
 0x976   :  { %2061 = vrcp.f32 %v912_v20 }
 0x983   :  { %v2062_v23 = vpop.eup %2061 }
 0x984   :  { %v920_v27 = vmul.f32 %v2062_v23, %v918_v26 }
 0x9e4   :  { %v923_v24 = vpop.permute.xlu0 %922 }
 0x9e5   :  { %v925_v25 = vmul.f32 %v2062_v23, %v923_v24 }
 0x9e7   :  { %927 = vrot.lane.b32.xlu0 %v925_v25, %s2299_s2 }
 0xa59   :  { %v928_v28 = vpop.permute.xlu0 %927 }
 0xa5a   :  { %v930_v29 = vadd.f32 %v928_v28, %v920_v27 }
 0xa5c   :  { %2063 = vtanh.f32 %v930_v29 }
 0xa69   :  { %v2064_v41 = vpop.eup %2063 }
 0xa6a   :  { %933 = vrot.lane.b32.xlu1 %v2064_v41, %s2298_s1 }
 0xa6e   :  { %944 = vrot.lane.b32.xlu1 %v930_v29, %s2301_s5 }
 0xadc   :  { %v934_v30 = vpop.permute.xlu1 %933 }
 0xadd   :  { %v936_v31 = vmul.f32 %v2062_v23, %v934_v30 }
 0xadf   :  { %939 = vrot.lane.b32.xlu0 %v936_v31, %s2299_s2 }
 0xae0   :  { %v945_v32 = vpop.permute.xlu1 %944 }
 0xae1   :  { %v947_v33 = vsel %vm937_vm8, %v945_v32, %v832_v7 }
 0xae2   :  { %1032 = vrot.lane.b32.xlu1 %v947_v33, %s2299_s2 }
 0xb51   :  { %v940_v35 = vpop.permute.xlu0 %939 }
 0xb52   :  { %v942_v36 = vsel %vm937_vm8, %v940_v35, %v827_v10 }
 0xb53   :  { %1946 = vmatmul.mubr.msk.f32.vlgmr.msra.gmra.mxu0 %vm493_vm4, %v942_v36 }
 0xb54   :  { %1960 = vmatpush3.msra.mxu0 %v2445_v9  ;;  %1967 = vmatprep.mubr.msk.f32.mxu0 %vm2297_vm3, %v2296_v11  ;;  %v1033_v48 = vpop.permute.xlu1 %1032 }
 0xb55   :  { %1961 = vmatprep.subr.mxu0 %v2296_v11 }
 0xb56   :  { %1962 = vmatpush3.msra.mxu0 %v2463_v15 }
 0xb57   :  { %1963 = vmatprep.subr.mxu0 %v2296_v11 }
 0xb58   :  { %1964 = vmatpush3.msra.mxu0 %v2478_v19 }
 0xb59   :  { %1965 = vmatprep.subr.mxu0 %v2296_v11 }
 0xb5a   :  { %1966 = vmatpush3.msra.mxu0 %v2490_v22 }
 0xb5b   :  { %1981 = vmatprep.subr.mxu0 %v2296_v11 }
 0xc13   :  { %v1019_v37 = vpop.f32.mrf.mxu0 }
 0xc14   :  { %v1023_v38 = vadd.f32 %v1019_v37, %v2547_v55 }
 0xc15   :  { %v1947_v39 = vpop.f32.mrf.mxu0 }
 0xc16   :  { %2065 = vtanh.f32 %v1023_v38  ;;  %v1763_v42 = vmul.f32 -1.442695, %v1023_v38 }
 0xc18   :  { %2067 = vpow2.f32 %v1763_v42 }
 0xc23   :  { %v2066_v40 = vpop.eup %2065 }
 0xc24   :  { %1037 = vrot.lane.b32.xlu0 %v2066_v40, %s2298_s1 }
 0xc25   :  { %v2068_v34 = vpop.eup %2067 }
 0xc26   :  { %v1027_v43 = vadd.f32 1.0, %v2068_v34 }
 0xc28   :  { %2069 = vrcp.f32 %v1027_v43 }
 0xc35   :  { %v2070_v44 = vpop.eup %2069 }
 0xc36   :  { %v1035_v49 = vmul.f32 %v2070_v44, %v1033_v48 }
 0xc96   :  { %v1038_v45 = vpop.permute.xlu0 %1037 }
 0xc97   :  { %v1040_v47 = vmul.f32 %v2070_v44, %v1038_v45 }
 0xc99   :  { %1042 = vrot.lane.b32.xlu0 %v1040_v47, %s2299_s2 }
 0xd0b   :  { %v1043_v51 = vpop.permute.xlu0 %1042 }
 0xd0c   :  { %v1045_v52 = vadd.f32 %v1043_v51, %v1035_v49 }
 0xd0e   :  { %2071 = vtanh.f32 %v1045_v52 }
 0xd1b   :  { %v2072_v55 = vpop.eup %2071 }
 0xd1c   :  { %1048 = vrot.lane.b32.xlu1 %v2072_v55, %s2298_s1 }
 0xd20   :  { %1059 = vrot.lane.b32.xlu1 %v1045_v52, %s2301_s5 }
 0xd8e   :  { %v1049_v53 = vpop.permute.xlu1 %1048 }
 0xd8f   :  { %v1051_v54 = vmul.f32 %v2070_v44, %v1049_v53 }
 0xd91   :  { %1054 = vrot.lane.b32.xlu0 %v1051_v54, %s2299_s2  ;;  %v1463_v54 = vld [vmem:[#allocation13 + $0x10] sm:$0xff] }
 0xd92   :  { %v1060_v56 = vpop.permute.xlu1 %1059 }
 0xd93   :  { %v1062_v57 = vsel %vm1052_vm9, %v1060_v56, %v947_v33  ;;  %v1462_v56 = vld [vmem:[#allocation13 + $0x8] sm:$0xff] }
 0xd94   :  { %1147 = vrot.lane.b32.xlu1 %v1062_v57, %s2299_s2 }
 0xe03   :  { %v1055_v58 = vpop.permute.xlu0 %1054 }
 0xe04   :  { %v1057_v59 = vsel %vm1052_vm9, %v1055_v58, %v942_v36  ;;  %v1461_v58 = vld [vmem:[#allocation13] sm:$0xff] }
 0xe05   :  { %1957 = vmatmul.mubr.msk.f32.vlgmr.msra.gmra.mxu1 %vm493_vm4, %v1057_v59 }
 0xe06   :  { %1971 = vmatpush3.msra.mxu1 %v2445_v9  ;;  %1978 = vmatprep.mubr.msk.f32.mxu1 %vm2297_vm3, %v2296_v11 }
 0xe07   :  { %1972 = vmatprep.subr.mxu1 %v2296_v11 }
 0xe08   :  { %1973 = vmatpush3.msra.mxu1 %v2463_v15 }
 0xe09   :  { %1974 = vmatprep.subr.mxu1 %v2296_v11 }
 0xe0a   :  { %1975 = vmatpush3.msra.mxu1 %v2478_v19 }
 0xe0b   :  { %1976 = vmatprep.subr.mxu1 %v2296_v11 }
 0xe0c   :  { %1977 = vmatpush3.msra.mxu1 %v2490_v22  ;;  %v1148_v22 = vpop.permute.xlu1 %1147 }
 0xe0d   :  { %1992 = vmatprep.subr.mxu1 %v2296_v11 }
 0xec5   :  { %v1134_v61 = vpop.f32.mrf.mxu1 }
 0xec6   :  { %v1138_v9 = vadd.f32 %v1134_v61, %v2545_v50 }
 0xec7   :  { %v1958_v63 = vpop.f32.mrf.mxu1 }
 0xec8   :  { %2073 = vtanh.f32 %v1138_v9  ;;  %v1765_v1 = vmul.f32 -1.442695, %v1138_v9 }
 0xeca   :  { %2075 = vpow2.f32 %v1765_v1  ;;  %v1550_v1 = vld [vmem:[#allocation16 + $0x10] sm:$0xff] }
 0xed5   :  { %v2074_v0 = vpop.eup %2073 }
 0xed6   :  { %1152 = vrot.lane.b32.xlu0 %v2074_v0, %s2298_s1  ;;  %v1551_v0 = vld [vmem:[#allocation16 + $0x18] sm:$0xff] }
 0xed7   :  { %v2076_v15 = vpop.eup %2075 }
 0xed8   :  { %v1142_v2 = vadd.f32 1.0, %v2076_v15  ;;  %v1549_v15 = vld [vmem:[#allocation16 + $0x8] sm:$0xff] }
 0xeda   :  { %2077 = vrcp.f32 %v1142_v2  ;;  %v1548_v2 = vld [vmem:[#allocation16] sm:$0xff] }
 0xee7   :  { %v2078_v19 = vpop.eup %2077 }
 0xee8   :  { %v1150_v4 = vmul.f32 %v2078_v19, %v1148_v22  ;;  %v1414_v22 = vld [vmem:[%s1413_s21] sm:$0x1] }
 0xf48   :  { %v1153_v3 = vpop.permute.xlu0 %1152 }
 0xf49   :  { %v1155_v46 = vmul.f32 %v2078_v19, %v1153_v3  ;;  %v1428_v3 = vrot.slane %v1408_v21, 7 }
 0xf4b   :  { %1157 = vrot.lane.b32.xlu0 %v1155_v46, %s2299_s2  ;;  %v1405_v46 = vld [vmem:[%s1404_s12] sm:$0x1] }
 0xfbd   :  { %v1158_v5 = vpop.permute.xlu0 %1157 }
 0xfbe   :  { %v1160_v6 = vadd.f32 %v1158_v5, %v1150_v4  ;;  %v1449_v5 = vsel %vm1448_vm13, %v1405_v46, %v1428_v3 }
 0xfc0   :  { %2079 = vtanh.f32 %v1160_v6 }
 0xfcd   :  { %v2080_v50 = vpop.eup %2079 }
 0xfce   :  { %1163 = vrot.lane.b32.xlu1 %v2080_v50, %s2298_s1  ;;  %v1434_v50 = vrot.slane %v1414_v22, 5 }
 0xfd2   :  { %1174 = vrot.lane.b32.xlu1 %v1160_v6, %s2301_s5 }
0x1040   :  { %v1164_v7 = vpop.permute.xlu1 %1163 }
0x1041   :  { %v1166_v8 = vmul.f32 %v2078_v19, %v1164_v7  ;;  %v1411_v19 = vld [vmem:[%s1410_s10] sm:$0x1] }
0x1042   :  { %v1431_v4 = vrot.slane %v1411_v19, 6 }
0x1043   :  { %1169 = vrot.lane.b32.xlu0 %v1166_v8, %s2299_s2 }
0x1044   :  { %v1175_v10 = vpop.permute.xlu1 %1174  ;;  %v1451_v7 = vsel %vm1450_vm14, %v1449_v5, %v1431_v4 }
0x1045   :  { %v1177_v12 = vsel %vm1167_vm10, %v1175_v10, %v1062_v57  ;;  %v1420_v10 = vld [vmem:[%s1419_s24] sm:$0x1] }
0x1046   :  { %1262 = vrot.lane.b32.xlu1 %v1177_v12, %s2299_s2 }
0x10b5   :  { %v1170_v13 = vpop.permute.xlu0 %1169 }
0x10b6   :  { %v1172_v14 = vsel %vm1167_vm10, %v1170_v13, %v1057_v59  ;;  %v1423_v13 = vld [vmem:[%s1422_s3] sm:$0x1] }
0x10b7   :  { %1968 = vmatmul.mubr.msk.f32.vlgmr.msra.gmra.mxu0 %vm493_vm4, %v1172_v14 }
0x10b8   :  { %1989 = vmatprep.mubr.msk.f32.mxu0 %vm2297_vm3, %v2296_v11  ;;  %v1263_v29 = vpop.permute.xlu1 %1262 }
0x1177   :  { %v1249_v16 = vpop.f32.mrf.mxu0 }
0x1178   :  { %v1253_v17 = vadd.f32 %v1249_v16, %v2551_v62 }
0x1179   :  { %v1969_v18 = vpop.f32.mrf.mxu0 }
0x117a   :  { %2081 = vtanh.f32 %v1253_v17  ;;  %v1767_v23 = vmul.f32 -1.442695, %v1253_v17  ;;  %v1443_v18 = vrot.slane %v1423_v13, 2 }
0x117c   :  { %2083 = vpow2.f32 %v1767_v23 }
0x1187   :  { %v2082_v20 = vpop.eup %2081 }
0x1188   :  { %1267 = vrot.lane.b32.xlu0 %v2082_v20, %s2298_s1 }
0x1189   :  { %v2084_v24 = vpop.eup %2083 }
0x118a   :  { %v1257_v25 = vadd.f32 1.0, %v2084_v24 }
0x118c   :  { %2085 = vrcp.f32 %v1257_v25 }
0x1199   :  { %v2086_v26 = vpop.eup %2085 }
0x119a   :  { %v1265_v41 = vmul.f32 %v2086_v26, %v1263_v29 }
0x11fa   :  { %v1268_v27 = vpop.permute.xlu0 %1267 }
0x11fb   :  { %v1270_v28 = vmul.f32 %v2086_v26, %v1268_v27  ;;  %v1778_v27 = vld [vmem:[#allocation14] ss:$0 sm:$0xff] }
0x11fd   :  { %1272 = vrot.lane.b32.xlu0 %v1270_v28, %s2299_s2 }
0x126f   :  { %v1273_v30 = vpop.permute.xlu0 %1272 }
0x1270   :  { %v1275_v31 = vadd.f32 %v1273_v30, %v1265_v41 }
0x1272   :  { %2087 = vtanh.f32 %v1275_v31 }
0x127f   :  { %v2088_v62 = vpop.eup %2087 }
0x1280   :  { %1278 = vrot.lane.b32.xlu1 %v2088_v62, %s2298_s1  ;;  %v1635_v62 = vld [vmem:[%s2753_s14 + $0x10] sm:$0xff] }
0x1284   :  { %1289 = vrot.lane.b32.xlu1 %v1275_v31, %s2301_s5  ;;  %v1636_v31 = vld [vmem:[%s2753_s14 + $0x18] sm:$0xff] }
0x12f2   :  { %v1279_v32 = vpop.permute.xlu1 %1278 }
0x12f3   :  { %v1281_v33 = vmul.f32 %v2086_v26, %v1279_v32  ;;  %v1634_v32 = vld [vmem:[%s2753_s14 + $0x8] sm:$0xff] }
0x12f5   :  { %1284 = vrot.lane.b32.xlu0 %v1281_v33, %s2299_s2  ;;  %v1633_v33 = vld [vmem:[%s2753_s14] sm:$0xff] }
0x12f6   :  { %v1290_v35 = vpop.permute.xlu1 %1289 }
0x12f7   :  { %v1292_v36 = vsel %vm1282_vm11, %v1290_v35, %v1177_v12  ;;  %v1453_v12 = vsel %vm1452_vm15, %v1451_v7, %v1434_v50  ;;  %v1779_v35 = vld [vmem:[#allocation17] ss:$0 sm:$0xff] }
0x12f8   :  { %1377 = vrot.lane.b32.xlu1 %v1292_v36, %s2299_s2 }
0x1367   :  { %v1285_v37 = vpop.permute.xlu0 %1284 }
0x1368   :  { %v1287_v38 = vsel %vm1282_vm11, %v1285_v37, %v1172_v14  ;;  %v1440_v14 = vrot.slane %v1420_v10, 3 }
0x1369   :  { %1979 = vmatmul.mubr.msk.f32.vlgmr.msra.gmra.mxu1 %vm493_vm4, %v1287_v38 }
0x136a   :  { %2000 = vmatprep.mubr.msk.f32.mxu1 %vm2297_vm3, %v2296_v11  ;;  %v1378_v51 = vpop.permute.xlu1 %1377  ;;  %1993 = vmatpush3.msra.mxu1 %v1551_v0 }
0x136b   :  { %1994 = vmatprep.subr.mxu1 %v2296_v11 }
0x136c   :  { %1995 = vmatpush3.msra.mxu1 %v1550_v1 }
0x136d   :  { %1996 = vmatprep.subr.mxu1 %v2296_v11 }
0x136e   :  { %1997 = vmatpush3.msra.mxu1 %v1549_v15 }
0x136f   :  { %1998 = vmatprep.subr.mxu1 %v2296_v11 }
0x1370   :  { %1999 = vmatpush3.msra.mxu1 %v1548_v2 }
0x1429   :  { %v1364_v39 = vpop.f32.mrf.mxu1 }
0x142a   :  { %v1368_v40 = vadd.f32 %v1364_v39, %v2549_v60  ;;  %v1464_v60 = vld [vmem:[#allocation13 + $0x18] sm:$0xff] }
0x142b   :  { %v1980_v42 = vpop.f32.mrf.mxu1  ;;  %1982 = vmatpush3.msra.mxu0 %v1464_v60 }
0x142c   :  { %2089 = vtanh.f32 %v1368_v40  ;;  %v1769_v43 = vmul.f32 -1.442695, %v1368_v40  ;;  %1983 = vmatprep.subr.mxu0 %v2296_v11  ;;  %v1781_v40 = vld [vmem:[#allocation3] ss:$0 sm:$0xff] }
0x142d   :  { %1984 = vmatpush3.msra.mxu0 %v1463_v54 }
0x142e   :  { %2091 = vpow2.f32 %v1769_v43  ;;  %1985 = vmatprep.subr.mxu0 %v2296_v11 }
0x142f   :  { %1986 = vmatpush3.msra.mxu0 %v1462_v56 }
0x1430   :  { %1987 = vmatprep.subr.mxu0 %v2296_v11 }
0x1431   :  { %1988 = vmatpush3.msra.mxu0 %v1461_v58 }
0x1432   :  { %2003 = vmatprep.subr.mxu0 %v2296_v11 }
0x1439   :  { %v2090_v34 = vpop.eup %2089 }
0x143a   :  { %1382 = vrot.lane.b32.xlu0 %v2090_v34, %s2298_s1 }
0x143b   :  { %v2092_v44 = vpop.eup %2091 }
0x143c   :  { %v1372_v45 = vadd.f32 1.0, %v2092_v44 }
0x143e   :  { %2093 = vrcp.f32 %v1372_v45 }
0x144b   :  { %v2094_v47 = vpop.eup %2093 }
0x144c   :  { %v1380_v52 = vmul.f32 %v2094_v47, %v1378_v51 }
0x14ac   :  { %v1383_v48 = vpop.permute.xlu0 %1382 }
0x14ad   :  { %v1385_v49 = vmul.f32 %v2094_v47, %v1383_v48 }
0x14af   :  { %1387 = vrot.lane.b32.xlu0 %v1385_v49, %s2299_s2 }
0x1521   :  { %v1388_v55 = vpop.permute.xlu0 %1387 }
0x1522   :  { %v1390_v53 = vadd.f32 %v1388_v55, %v1380_v52 }
0x1524   :  { %2095 = vtanh.f32 %v1390_v53 }
0x1531   :  { %v2096_v57 = vpop.eup %2095 }
0x1532   :  { %1393 = vrot.lane.b32.xlu1 %v2096_v57, %s2298_s1  ;;  %s1416_s1 = scalar_lea.vmem %s2748_s9, %s1773_s17 }
0x1533   :  { %v1417_v6 = vld [vmem:[%s1416_s1] sm:$0x1] }
0x1534   :  { %v1437_v8 = vrot.slane %v1417_v6, 4 }
0x1536   :  { %v1454_v16 = vsel %vm347_vm0, %v1453_v12, %v1437_v8  ;;  %vm1717_vm0 = vcmask 7168  }
0x1537   :  { %v1456_v20 = vsel %vm1455_vm1, %v1454_v16, %v1440_v14 }
0x1538   :  { %v1458_v24 = vsel %vm1457_vm2, %v1456_v20, %v1443_v18 }
0x15a4   :  { %v1394_v59 = vpop.permute.xlu1 %1393 }
0x15a5   :  { %v1396_v61 = vmul.f32 %v2094_v47, %v1394_v59 }
0x15a7   :  { %1399 = vrot.lane.b32.xlu0 %v1396_v61, %s2299_s2  ;;  %s1776_s2 = sld [smem:[#allocation4 + $0x7]] }
0x15ad   :  { %s1425_s8 = scalar_lea.vmem %s2748_s9, %s1776_s2 }
0x15ae   :  { %v1426_v17 = vld [vmem:[%s1425_s8] sm:$0x1] }
0x15af   :  { %v1446_v23 = vrot.slane %v1426_v17, 1 }
0x1619   :  { %v1400_v9 = vpop.permute.xlu0 %1399 }
0x161a   :  { %v1402_v63 = vsel %vm1397_vm12, %v1400_v9, %v1287_v38 }
0x161b   :  { %1990 = vmatmul.mubr.msk.f32.vlgmr.msra.gmra.mxu0 %vm493_vm4, %v1402_v63 }
0x161c   :  { %2011 = vmatprep.mubr.msk.f32.mxu0 %vm2297_vm3, %v2296_v11  ;;  %vm1459_vm3 = vcmask 1046528   ;;  %2004 = vmatpush3.msra.mxu0 %v1636_v31 }
0x161d   :  { %v1460_v25 = vsel %vm1459_vm3, %v1458_v24, %v1446_v23  ;;  %2005 = vmatprep.subr.mxu0 %v2296_v11 }
0x161e   :  { %2006 = vmatpush3.msra.mxu0 %v1635_v62 }
0x161f   :  { %2007 = vmatprep.subr.mxu0 %v2296_v11 }
0x1620   :  { %2008 = vmatpush3.msra.mxu0 %v1634_v32 }
0x1621   :  { %2009 = vmatprep.subr.mxu0 %v2296_v11 }
0x1622   :  { %2010 = vmatpush3.msra.mxu0 %v1633_v33 }
0x16db   :  { %v1534_v26 = vpop.f32.mrf.mxu0 }
0x16dc   :  { %v1538_v28 = vadd.f32 %v1534_v26, %v1460_v25 }
0x16dd   :  { %v1991_v29 = vpop.f32.mrf.mxu0 }
0x16de   :  { %v1546_v41 = vadd.f32 %v1778_v27, %v1538_v28 }
0x16e0   :  { %2097 = vtanh.f32 %v1546_v41 }
0x16ed   :  { %v2098_v30 = vpop.eup %2097 }
0x16ee   :  { %2001 = vmatmul.mubr.msk.f32.vlgmr.msra.gmra.mxu1 %vm493_vm4, %v2098_v30 }
0x17ae   :  { %v1628_v36 = vpop.f32.mrf.mxu1 }
0x17af   :  { %v1629_v37 = vadd.f32 %v1779_v35, %v1628_v36 }
0x17b0   :  { %v2002_v38 = vpop.f32.mrf.mxu1 }
0x17b1   :  { %2099 = vtanh.f32 %v1629_v37 }
0x17be   :  { %v2100_v39 = vpop.eup %2099 }
0x17bf   :  { %2012 = vmatmul.mubr.msk.f32.vlgmr.msra.gmra.mxu0 %vm493_vm4, %v2100_v39 }
0x187f   :  { %v1713_v42 = vpop.f32.mrf.mxu0 }
0x1880   :  { %v1714_v34 = vadd.f32 %v1781_v40, %v1713_v42 }
0x1881   :  { %v2013_v43 = vpop.f32.mrf.mxu0 }
0x1882   :  { %1718 = vst.msk [vmem:[%s2755_s16] sm:$0xff] %vm1717_vm0, %v1714_v34 }
0x1883   :  { %1723 = vsyncpa [#allocation5], 1 }
0x1884   :  { %1724 = vsyncpa [#allocation9], 1 }
0x1885   :  { %1725 = vsyncpa [#allocation12], 1 }
0x1886   :  { %1726 = vsyncpa [#allocation15], 1 }
0x1887   :  { %1727 = vsyncpa [#allocation18], 1 }
0x1888   :  { %1728 = vsyncpa [#allocation6], 1 }

</bundles_post_ra>
